<compile_context>
chip_gen: v6e
topology: v6e:2x2x1
jax: 0.10.0
libtpu: 0.0.40
codegen_flags: <defaults>
</compile_context>

<pallas_src>
import math

import jax
import jax.numpy as jnp
from jax.experimental import pallas as pl
from jax.experimental.pallas import tpu as pltpu

NUM_TECH = 9        # mix, falsetto, breathe, bubble, strong, weak, pharyngeal, vibrato, glissando
ROWS_PER_TECH = 3   # each nn.Embedding(3, H)
_MAX_TILE_ROWS = 2048      # max output rows per grid step
_SINGLE_TILE_ROWS = 1024   # at or below this, use a single grid step


def _round_up(x, m):
    return (x + m - 1) // m * m


def _cdiv(a, b):
    return (a + b - 1) // b


def _lane_groups(hidden_channels):
    """K = logical rows folded into one 128-lane output row."""
    if hidden_channels < 128 and 128 % hidden_channels == 0:
        return 128 // hidden_channels
    return 1


def init_params(key, hidden_channels):
    """Mimic the PyTorch init: normal(0, H^-0.5) on every row of every table
    (nn.init.normal_ overwrites the padding_idx row, so nothing is zeroed)."""
    keys = jax.random.split(key, NUM_TECH)
    std = hidden_channels ** (-0.5)
    return [jax.random.normal(k, (ROWS_PER_TECH, hidden_channels), jnp.float32) * std
            for k in keys]


def prepare_params(tables, hidden_channels):
    """Build the group-offset, sqrt(H)-scaled lookup table ONCE at param prep.

    Returns tab_big[27*K, K*H] with
      tab_big[g*27 + 3*j + v, g*H:(g+1)*H] = tables[j][v] * sqrt(H)
    and zeros elsewhere, where K = 128//H for H < 128 (else K = 1)."""
    H = hidden_channels
    K = _lane_groups(H)
    scale = math.sqrt(H)
    tab = jnp.concatenate([t.astype(jnp.float32) for t in tables], axis=0) * scale  # [27, H]
    if K == 1:
        return tab
    blocks = []
    for g in range(K):
        cols = [jnp.zeros_like(tab) for _ in range(K)]
        cols[g] = tab
        blocks.append(jnp.concatenate(cols, axis=1))       # [27, K*H]
    return jnp.concatenate(blocks, axis=0)                  # [27*K, K*H]


def _make_kernel(K):
    def kernel(packed_ref, tab_ref, o_ref):
        """packed_ref: [TR, K] int32 (nine 2-bit codes per logical row);
        tab_ref: [27*K, K*H] f32 group-offset table; o_ref: [TR, K*H] f32."""
        packed = packed_ref[...]                                   # [TR, K]
        acc = jnp.zeros(o_ref.shape, jnp.float32)
        for j in range(NUM_TECH):                                  # static unroll (9)
            cj = (packed >> (2 * j)) & 3                           # [TR, K]
            for g in range(K):                                     # static unroll (K)
                c = cj[:, g:g + 1]                                 # [TR, 1]
                base = (g * NUM_TECH + j) * ROWS_PER_TECH
                r0 = tab_ref[base + 0:base + 1, :]                 # [1, K*H]
                r1 = tab_ref[base + 1:base + 2, :]
                r2 = tab_ref[base + 2:base + 3, :]
                # 3-row "gather" as two broadcast VPU selects; table rows are
                # zero outside lane group g, so no extra masking op is needed.
                acc = acc + jnp.where(c == 0, r0, jnp.where(c == 1, r1, r2))
        o_ref[...] = acc
    return kernel


@jax.jit
def multi_tech_encoder(tab_big, mix, falsetto, breathe, bubble, strong,
                       weak, pharyngeal, vibrato, glissando):
    techs = (mix, falsetto, breathe, bubble, strong, weak, pharyngeal,
             vibrato, glissando)
    B, T = mix.shape
    K = tab_big.shape[0] // (NUM_TECH * ROWS_PER_TECH)
    L = tab_big.shape[1]
    H = L // K
    N = B * T

    # Pack the nine {0,1,2} codes of each row into one int32 (2 bits each):
    # 4 B/row of index HBM traffic instead of 36 B/row.
    idx = jnp.stack([t.reshape(N).astype(jnp.int32) for t in techs], axis=1)  # [N, 9]
    shifts = (2 * jnp.arange(NUM_TECH, dtype=jnp.int32))[None, :]
    packed = jnp.sum(idx << shifts, axis=1).astype(jnp.int32)                 # [N]

    n_pad = _round_up(N, K)
    if n_pad != N:
        packed = jnp.pad(packed, (0, n_pad - N))
    R = n_pad // K                       # output rows (K logical rows each)
    packed = packed.reshape(R, K)

    if R <= _SINGLE_TILE_ROWS:
        tr, r_pad = R, R                 # single tile; no grid/row padding
    else:
        # Big tiles to amortise per-step overhead, but keep >=4 grid steps so
        # the "parallel" axis can shard across v7x's two TensorCores.
        tr = min(_MAX_TILE_ROWS, _round_up(_cdiv(R, 4), 8))
        r_pad = _round_up(R, tr)
        if r_pad != R:
            packed = jnp.pad(packed, ((0, r_pad - R), (0, 0)))

    out = pl.pallas_call(
        _make_kernel(K),
        out_shape=jax.ShapeDtypeStruct((r_pad, L), jnp.float32),
        grid_spec=pltpu.PrefetchScalarGridSpec(
            num_scalar_prefetch=0,
            grid=(r_pad // tr,),
            in_specs=[
                pl.BlockSpec((tr, K), lambda i: (i, 0)),
                # Constant block index -> table stays VMEM-resident across steps.
                pl.BlockSpec((NUM_TECH * ROWS_PER_TECH * K, L), lambda i: (0, 0)),
            ],
            out_specs=pl.BlockSpec((tr, L), lambda i: (i, 0)),
        ),
        compiler_params=pltpu.CompilerParams(
            dimension_semantics=("parallel",)),
    )(packed, tab_big)

    # Lane-packed [r_pad, K*H] -> row-major [r_pad*K, H] is a contiguous reshape.
    out = out.reshape(r_pad * K, H)
    if r_pad * K != N:
        out = out[:N]   # only hit when B*T isn't a multiple of K / the row tile
    return out.reshape(B, T, H)


if __name__ == "__main__":
    key = jax.random.PRNGKey(0)
    kp, ki = jax.random.split(key)

    hidden_channels = 32
    B, T = 2, 8

    tables = init_params(kp, hidden_channels)
    tab_big = prepare_params(tables, hidden_channels)      # one-time param prep

    idx_keys = jax.random.split(ki, NUM_TECH)
    techs = [jax.random.randint(k, (B, T), 0, 3, dtype=jnp.int32) for k in idx_keys]

    out = multi_tech_encoder(tab_big, *techs)
    out = jax.block_until_ready(out)

    # Pure-JAX reference (matches the PyTorch module).
    ref = sum(tables[j][techs[j]] for j in range(NUM_TECH)) * math.sqrt(hidden_channels)
    assert out.shape == (B, T, hidden_channels)
    assert jnp.allclose(out, ref, atol=1e-5, rtol=1e-5), \
        float(jnp.max(jnp.abs(out - ref)))

    print("KERNEL_OK")
</pallas_src>

<mosaic_0001>
module attributes {stable_mosaic.version = 11 : i64} {
  func.func @kernel(%arg0: i32, %arg1: memref<4x4xi32, #tpu.memory_space<vmem>>, %arg2: memref<108x128xf32, #tpu.memory_space<vmem>>, %arg3: memref<4x128xf32, #tpu.memory_space<vmem>>) attributes {dimension_semantics = [#tpu.dimension_semantics<parallel>], iteration_bounds = array<i64: 1>, scalar_prefetch = 0 : i64, scratch_operands = 0 : i64, tpu.core_type = #tpu.core_type<tc>, window_params = [{transform_indices = @transform_0, window_bounds = array<i64: 4, 4>}, {pipeline_mode = #tpu.pipeline_mode<synchronous>, transform_indices = @transform_1, window_bounds = array<i64: 108, 128>}, {transform_indices = @transform_2, window_bounds = array<i64: 4, 128>}]} {
    %c0 = arith.constant 0 : index
    %c0_0 = arith.constant 0 : index
    %0 = vector.load %arg1[%c0, %c0_0] : memref<4x4xi32, #tpu.memory_space<vmem>>, vector<4x4xi32>
    %cst = arith.constant 0.000000e+00 : f32
    %1 = vector.broadcast %cst : f32 to vector<4x128xf32>
    %c0_i32 = arith.constant 0 : i32
    %2 = vector.broadcast %c0_i32 : i32 to vector<4x4xi32>
    %3 = arith.shrsi %0, %2 : vector<4x4xi32>
    %c3_i32 = arith.constant 3 : i32
    %4 = vector.broadcast %c3_i32 : i32 to vector<4x4xi32>
    %5 = arith.andi %3, %4 : vector<4x4xi32>
    %6 = vector.extract_strided_slice %5 {offsets = [0, 0], sizes = [4, 1], strides = [1, 1]} : vector<4x4xi32> to vector<4x1xi32>
    %c0_1 = arith.constant 0 : index
    %c0_2 = arith.constant 0 : index
    %7 = vector.load %arg2[%c0_1, %c0_2] : memref<108x128xf32, #tpu.memory_space<vmem>>, vector<1x128xf32>
    %c1 = arith.constant 1 : index
    %c0_3 = arith.constant 0 : index
    %8 = vector.load %arg2[%c1, %c0_3] : memref<108x128xf32, #tpu.memory_space<vmem>>, vector<1x128xf32>
    %c2 = arith.constant 2 : index
    %c0_4 = arith.constant 0 : index
    %9 = vector.load %arg2[%c2, %c0_4] : memref<108x128xf32, #tpu.memory_space<vmem>>, vector<1x128xf32>
    %c0_i32_5 = arith.constant 0 : i32
    %10 = vector.broadcast %c0_i32_5 : i32 to vector<4x1xi32>
    %11 = arith.cmpi eq, %6, %10 : vector<4x1xi32>
    %c1_i32 = arith.constant 1 : i32
    %12 = vector.broadcast %c1_i32 : i32 to vector<4x1xi32>
    %13 = arith.cmpi eq, %6, %12 : vector<4x1xi32>
    %14 = vector.shape_cast %13 : vector<4x1xi1> to vector<4x1xi1>
    %15 = vector.broadcast %14 : vector<4x1xi1> to vector<4x128xi1>
    %16 = vector.shape_cast %8 : vector<1x128xf32> to vector<1x128xf32>
    %17 = vector.broadcast %16 : vector<1x128xf32> to vector<4x128xf32>
    %18 = vector.shape_cast %9 : vector<1x128xf32> to vector<1x128xf32>
    %19 = vector.broadcast %18 : vector<1x128xf32> to vector<4x128xf32>
    %20 = arith.select %15, %17, %19 : vector<4x128xi1>, vector<4x128xf32>
    %21 = vector.shape_cast %11 : vector<4x1xi1> to vector<4x1xi1>
    %22 = vector.broadcast %21 : vector<4x1xi1> to vector<4x128xi1>
    %23 = vector.shape_cast %7 : vector<1x128xf32> to vector<1x128xf32>
    %24 = vector.broadcast %23 : vector<1x128xf32> to vector<4x128xf32>
    %25 = arith.select %22, %24, %20 : vector<4x128xi1>, vector<4x128xf32>
    %26 = arith.addf %1, %25 : vector<4x128xf32>
    %27 = vector.extract_strided_slice %5 {offsets = [0, 1], sizes = [4, 1], strides = [1, 1]} : vector<4x4xi32> to vector<4x1xi32>
    %c27 = arith.constant 27 : index
    %c0_6 = arith.constant 0 : index
    %28 = vector.load %arg2[%c27, %c0_6] : memref<108x128xf32, #tpu.memory_space<vmem>>, vector<1x128xf32>
    %c28 = arith.constant 28 : index
    %c0_7 = arith.constant 0 : index
    %29 = vector.load %arg2[%c28, %c0_7] : memref<108x128xf32, #tpu.memory_space<vmem>>, vector<1x128xf32>
    %c29 = arith.constant 29 : index
    %c0_8 = arith.constant 0 : index
    %30 = vector.load %arg2[%c29, %c0_8] : memref<108x128xf32, #tpu.memory_space<vmem>>, vector<1x128xf32>
    %c0_i32_9 = arith.constant 0 : i32
    %31 = vector.broadcast %c0_i32_9 : i32 to vector<4x1xi32>
    %32 = arith.cmpi eq, %27, %31 : vector<4x1xi32>
    %c1_i32_10 = arith.constant 1 : i32
    %33 = vector.broadcast %c1_i32_10 : i32 to vector<4x1xi32>
    %34 = arith.cmpi eq, %27, %33 : vector<4x1xi32>
    %35 = vector.shape_cast %34 : vector<4x1xi1> to vector<4x1xi1>
    %36 = vector.broadcast %35 : vector<4x1xi1> to vector<4x128xi1>
    %37 = vector.shape_cast %29 : vector<1x128xf32> to vector<1x128xf32>
    %38 = vector.broadcast %37 : vector<1x128xf32> to vector<4x128xf32>
    %39 = vector.shape_cast %30 : vector<1x128xf32> to vector<1x128xf32>
    %40 = vector.broadcast %39 : vector<1x128xf32> to vector<4x128xf32>
    %41 = arith.select %36, %38, %40 : vector<4x128xi1>, vector<4x128xf32>
    %42 = vector.shape_cast %32 : vector<4x1xi1> to vector<4x1xi1>
    %43 = vector.broadcast %42 : vector<4x1xi1> to vector<4x128xi1>
    %44 = vector.shape_cast %28 : vector<1x128xf32> to vector<1x128xf32>
    %45 = vector.broadcast %44 : vector<1x128xf32> to vector<4x128xf32>
    %46 = arith.select %43, %45, %41 : vector<4x128xi1>, vector<4x128xf32>
    %47 = arith.addf %26, %46 : vector<4x128xf32>
    %48 = vector.extract_strided_slice %5 {offsets = [0, 2], sizes = [4, 1], strides = [1, 1]} : vector<4x4xi32> to vector<4x1xi32>
    %c54 = arith.constant 54 : index
    %c0_11 = arith.constant 0 : index
    %49 = vector.load %arg2[%c54, %c0_11] : memref<108x128xf32, #tpu.memory_space<vmem>>, vector<1x128xf32>
    %c55 = arith.constant 55 : index
    %c0_12 = arith.constant 0 : index
    %50 = vector.load %arg2[%c55, %c0_12] : memref<108x128xf32, #tpu.memory_space<vmem>>, vector<1x128xf32>
    %c56 = arith.constant 56 : index
    %c0_13 = arith.constant 0 : index
    %51 = vector.load %arg2[%c56, %c0_13] : memref<108x128xf32, #tpu.memory_space<vmem>>, vector<1x128xf32>
    %c0_i32_14 = arith.constant 0 : i32
    %52 = vector.broadcast %c0_i32_14 : i32 to vector<4x1xi32>
    %53 = arith.cmpi eq, %48, %52 : vector<4x1xi32>
    %c1_i32_15 = arith.constant 1 : i32
    %54 = vector.broadcast %c1_i32_15 : i32 to vector<4x1xi32>
    %55 = arith.cmpi eq, %48, %54 : vector<4x1xi32>
    %56 = vector.shape_cast %55 : vector<4x1xi1> to vector<4x1xi1>
    %57 = vector.broadcast %56 : vector<4x1xi1> to vector<4x128xi1>
    %58 = vector.shape_cast %50 : vector<1x128xf32> to vector<1x128xf32>
    %59 = vector.broadcast %58 : vector<1x128xf32> to vector<4x128xf32>
    %60 = vector.shape_cast %51 : vector<1x128xf32> to vector<1x128xf32>
    %61 = vector.broadcast %60 : vector<1x128xf32> to vector<4x128xf32>
    %62 = arith.select %57, %59, %61 : vector<4x128xi1>, vector<4x128xf32>
    %63 = vector.shape_cast %53 : vector<4x1xi1> to vector<4x1xi1>
    %64 = vector.broadcast %63 : vector<4x1xi1> to vector<4x128xi1>
    %65 = vector.shape_cast %49 : vector<1x128xf32> to vector<1x128xf32>
    %66 = vector.broadcast %65 : vector<1x128xf32> to vector<4x128xf32>
    %67 = arith.select %64, %66, %62 : vector<4x128xi1>, vector<4x128xf32>
    %68 = arith.addf %47, %67 : vector<4x128xf32>
    %69 = vector.extract_strided_slice %5 {offsets = [0, 3], sizes = [4, 1], strides = [1, 1]} : vector<4x4xi32> to vector<4x1xi32>
    %c81 = arith.constant 81 : index
    %c0_16 = arith.constant 0 : index
    %70 = vector.load %arg2[%c81, %c0_16] : memref<108x128xf32, #tpu.memory_space<vmem>>, vector<1x128xf32>
    %c82 = arith.constant 82 : index
    %c0_17 = arith.constant 0 : index
    %71 = vector.load %arg2[%c82, %c0_17] : memref<108x128xf32, #tpu.memory_space<vmem>>, vector<1x128xf32>
    %c83 = arith.constant 83 : index
    %c0_18 = arith.constant 0 : index
    %72 = vector.load %arg2[%c83, %c0_18] : memref<108x128xf32, #tpu.memory_space<vmem>>, vector<1x128xf32>
    %c0_i32_19 = arith.constant 0 : i32
    %73 = vector.broadcast %c0_i32_19 : i32 to vector<4x1xi32>
    %74 = arith.cmpi eq, %69, %73 : vector<4x1xi32>
    %c1_i32_20 = arith.constant 1 : i32
    %75 = vector.broadcast %c1_i32_20 : i32 to vector<4x1xi32>
    %76 = arith.cmpi eq, %69, %75 : vector<4x1xi32>
    %77 = vector.shape_cast %76 : vector<4x1xi1> to vector<4x1xi1>
    %78 = vector.broadcast %77 : vector<4x1xi1> to vector<4x128xi1>
    %79 = vector.shape_cast %71 : vector<1x128xf32> to vector<1x128xf32>
    %80 = vector.broadcast %79 : vector<1x128xf32> to vector<4x128xf32>
    %81 = vector.shape_cast %72 : vector<1x128xf32> to vector<1x128xf32>
    %82 = vector.broadcast %81 : vector<1x128xf32> to vector<4x128xf32>
    %83 = arith.select %78, %80, %82 : vector<4x128xi1>, vector<4x128xf32>
    %84 = vector.shape_cast %74 : vector<4x1xi1> to vector<4x1xi1>
    %85 = vector.broadcast %84 : vector<4x1xi1> to vector<4x128xi1>
    %86 = vector.shape_cast %70 : vector<1x128xf32> to vector<1x128xf32>
    %87 = vector.broadcast %86 : vector<1x128xf32> to vector<4x128xf32>
    %88 = arith.select %85, %87, %83 : vector<4x128xi1>, vector<4x128xf32>
    %89 = arith.addf %68, %88 : vector<4x128xf32>
    %c2_i32 = arith.constant 2 : i32
    %90 = vector.broadcast %c2_i32 : i32 to vector<4x4xi32>
    %91 = arith.shrsi %0, %90 : vector<4x4xi32>
    %c3_i32_21 = arith.constant 3 : i32
    %92 = vector.broadcast %c3_i32_21 : i32 to vector<4x4xi32>
    %93 = arith.andi %91, %92 : vector<4x4xi32>
    %94 = vector.extract_strided_slice %93 {offsets = [0, 0], sizes = [4, 1], strides = [1, 1]} : vector<4x4xi32> to vector<4x1xi32>
    %c3 = arith.constant 3 : index
    %c0_22 = arith.constant 0 : index
    %95 = vector.load %arg2[%c3, %c0_22] : memref<108x128xf32, #tpu.memory_space<vmem>>, vector<1x128xf32>
    %c4 = arith.constant 4 : index
    %c0_23 = arith.constant 0 : index
    %96 = vector.load %arg2[%c4, %c0_23] : memref<108x128xf32, #tpu.memory_space<vmem>>, vector<1x128xf32>
    %c5 = arith.constant 5 : index
    %c0_24 = arith.constant 0 : index
    %97 = vector.load %arg2[%c5, %c0_24] : memref<108x128xf32, #tpu.memory_space<vmem>>, vector<1x128xf32>
    %c0_i32_25 = arith.constant 0 : i32
    %98 = vector.broadcast %c0_i32_25 : i32 to vector<4x1xi32>
    %99 = arith.cmpi eq, %94, %98 : vector<4x1xi32>
    %c1_i32_26 = arith.constant 1 : i32
    %100 = vector.broadcast %c1_i32_26 : i32 to vector<4x1xi32>
    %101 = arith.cmpi eq, %94, %100 : vector<4x1xi32>
    %102 = vector.shape_cast %101 : vector<4x1xi1> to vector<4x1xi1>
    %103 = vector.broadcast %102 : vector<4x1xi1> to vector<4x128xi1>
    %104 = vector.shape_cast %96 : vector<1x128xf32> to vector<1x128xf32>
    %105 = vector.broadcast %104 : vector<1x128xf32> to vector<4x128xf32>
    %106 = vector.shape_cast %97 : vector<1x128xf32> to vector<1x128xf32>
    %107 = vector.broadcast %106 : vector<1x128xf32> to vector<4x128xf32>
    %108 = arith.select %103, %105, %107 : vector<4x128xi1>, vector<4x128xf32>
    %109 = vector.shape_cast %99 : vector<4x1xi1> to vector<4x1xi1>
    %110 = vector.broadcast %109 : vector<4x1xi1> to vector<4x128xi1>
    %111 = vector.shape_cast %95 : vector<1x128xf32> to vector<1x128xf32>
    %112 = vector.broadcast %111 : vector<1x128xf32> to vector<4x128xf32>
    %113 = arith.select %110, %112, %108 : vector<4x128xi1>, vector<4x128xf32>
    %114 = arith.addf %89, %113 : vector<4x128xf32>
    %115 = vector.extract_strided_slice %93 {offsets = [0, 1], sizes = [4, 1], strides = [1, 1]} : vector<4x4xi32> to vector<4x1xi32>
    %c30 = arith.constant 30 : index
    %c0_27 = arith.constant 0 : index
    %116 = vector.load %arg2[%c30, %c0_27] : memref<108x128xf32, #tpu.memory_space<vmem>>, vector<1x128xf32>
    %c31 = arith.constant 31 : index
    %c0_28 = arith.constant 0 : index
    %117 = vector.load %arg2[%c31, %c0_28] : memref<108x128xf32, #tpu.memory_space<vmem>>, vector<1x128xf32>
    %c32 = arith.constant 32 : index
    %c0_29 = arith.constant 0 : index
    %118 = vector.load %arg2[%c32, %c0_29] : memref<108x128xf32, #tpu.memory_space<vmem>>, vector<1x128xf32>
    %c0_i32_30 = arith.constant 0 : i32
    %119 = vector.broadcast %c0_i32_30 : i32 to vector<4x1xi32>
    %120 = arith.cmpi eq, %115, %119 : vector<4x1xi32>
    %c1_i32_31 = arith.constant 1 : i32
    %121 = vector.broadcast %c1_i32_31 : i32 to vector<4x1xi32>
    %122 = arith.cmpi eq, %115, %121 : vector<4x1xi32>
    %123 = vector.shape_cast %122 : vector<4x1xi1> to vector<4x1xi1>
    %124 = vector.broadcast %123 : vector<4x1xi1> to vector<4x128xi1>
    %125 = vector.shape_cast %117 : vector<1x128xf32> to vector<1x128xf32>
    %126 = vector.broadcast %125 : vector<1x128xf32> to vector<4x128xf32>
    %127 = vector.shape_cast %118 : vector<1x128xf32> to vector<1x128xf32>
    %128 = vector.broadcast %127 : vector<1x128xf32> to vector<4x128xf32>
    %129 = arith.select %124, %126, %128 : vector<4x128xi1>, vector<4x128xf32>
    %130 = vector.shape_cast %120 : vector<4x1xi1> to vector<4x1xi1>
    %131 = vector.broadcast %130 : vector<4x1xi1> to vector<4x128xi1>
    %132 = vector.shape_cast %116 : vector<1x128xf32> to vector<1x128xf32>
    %133 = vector.broadcast %132 : vector<1x128xf32> to vector<4x128xf32>
    %134 = arith.select %131, %133, %129 : vector<4x128xi1>, vector<4x128xf32>
    %135 = arith.addf %114, %134 : vector<4x128xf32>
    %136 = vector.extract_strided_slice %93 {offsets = [0, 2], sizes = [4, 1], strides = [1, 1]} : vector<4x4xi32> to vector<4x1xi32>
    %c57 = arith.constant 57 : index
    %c0_32 = arith.constant 0 : index
    %137 = vector.load %arg2[%c57, %c0_32] : memref<108x128xf32, #tpu.memory_space<vmem>>, vector<1x128xf32>
    %c58 = arith.constant 58 : index
    %c0_33 = arith.constant 0 : index
    %138 = vector.load %arg2[%c58, %c0_33] : memref<108x128xf32, #tpu.memory_space<vmem>>, vector<1x128xf32>
    %c59 = arith.constant 59 : index
    %c0_34 = arith.constant 0 : index
    %139 = vector.load %arg2[%c59, %c0_34] : memref<108x128xf32, #tpu.memory_space<vmem>>, vector<1x128xf32>
    %c0_i32_35 = arith.constant 0 : i32
    %140 = vector.broadcast %c0_i32_35 : i32 to vector<4x1xi32>
    %141 = arith.cmpi eq, %136, %140 : vector<4x1xi32>
    %c1_i32_36 = arith.constant 1 : i32
    %142 = vector.broadcast %c1_i32_36 : i32 to vector<4x1xi32>
    %143 = arith.cmpi eq, %136, %142 : vector<4x1xi32>
    %144 = vector.shape_cast %143 : vector<4x1xi1> to vector<4x1xi1>
    %145 = vector.broadcast %144 : vector<4x1xi1> to vector<4x128xi1>
    %146 = vector.shape_cast %138 : vector<1x128xf32> to vector<1x128xf32>
    %147 = vector.broadcast %146 : vector<1x128xf32> to vector<4x128xf32>
    %148 = vector.shape_cast %139 : vector<1x128xf32> to vector<1x128xf32>
    %149 = vector.broadcast %148 : vector<1x128xf32> to vector<4x128xf32>
    %150 = arith.select %145, %147, %149 : vector<4x128xi1>, vector<4x128xf32>
    %151 = vector.shape_cast %141 : vector<4x1xi1> to vector<4x1xi1>
    %152 = vector.broadcast %151 : vector<4x1xi1> to vector<4x128xi1>
    %153 = vector.shape_cast %137 : vector<1x128xf32> to vector<1x128xf32>
    %154 = vector.broadcast %153 : vector<1x128xf32> to vector<4x128xf32>
    %155 = arith.select %152, %154, %150 : vector<4x128xi1>, vector<4x128xf32>
    %156 = arith.addf %135, %155 : vector<4x128xf32>
    %157 = vector.extract_strided_slice %93 {offsets = [0, 3], sizes = [4, 1], strides = [1, 1]} : vector<4x4xi32> to vector<4x1xi32>
    %c84 = arith.constant 84 : index
    %c0_37 = arith.constant 0 : index
    %158 = vector.load %arg2[%c84, %c0_37] : memref<108x128xf32, #tpu.memory_space<vmem>>, vector<1x128xf32>
    %c85 = arith.constant 85 : index
    %c0_38 = arith.constant 0 : index
    %159 = vector.load %arg2[%c85, %c0_38] : memref<108x128xf32, #tpu.memory_space<vmem>>, vector<1x128xf32>
    %c86 = arith.constant 86 : index
    %c0_39 = arith.constant 0 : index
    %160 = vector.load %arg2[%c86, %c0_39] : memref<108x128xf32, #tpu.memory_space<vmem>>, vector<1x128xf32>
    %c0_i32_40 = arith.constant 0 : i32
    %161 = vector.broadcast %c0_i32_40 : i32 to vector<4x1xi32>
    %162 = arith.cmpi eq, %157, %161 : vector<4x1xi32>
    %c1_i32_41 = arith.constant 1 : i32
    %163 = vector.broadcast %c1_i32_41 : i32 to vector<4x1xi32>
    %164 = arith.cmpi eq, %157, %163 : vector<4x1xi32>
    %165 = vector.shape_cast %164 : vector<4x1xi1> to vector<4x1xi1>
    %166 = vector.broadcast %165 : vector<4x1xi1> to vector<4x128xi1>
    %167 = vector.shape_cast %159 : vector<1x128xf32> to vector<1x128xf32>
    %168 = vector.broadcast %167 : vector<1x128xf32> to vector<4x128xf32>
    %169 = vector.shape_cast %160 : vector<1x128xf32> to vector<1x128xf32>
    %170 = vector.broadcast %169 : vector<1x128xf32> to vector<4x128xf32>
    %171 = arith.select %166, %168, %170 : vector<4x128xi1>, vector<4x128xf32>
    %172 = vector.shape_cast %162 : vector<4x1xi1> to vector<4x1xi1>
    %173 = vector.broadcast %172 : vector<4x1xi1> to vector<4x128xi1>
    %174 = vector.shape_cast %158 : vector<1x128xf32> to vector<1x128xf32>
    %175 = vector.broadcast %174 : vector<1x128xf32> to vector<4x128xf32>
    %176 = arith.select %173, %175, %171 : vector<4x128xi1>, vector<4x128xf32>
    %177 = arith.addf %156, %176 : vector<4x128xf32>
    %c4_i32 = arith.constant 4 : i32
    %178 = vector.broadcast %c4_i32 : i32 to vector<4x4xi32>
    %179 = arith.shrsi %0, %178 : vector<4x4xi32>
    %c3_i32_42 = arith.constant 3 : i32
    %180 = vector.broadcast %c3_i32_42 : i32 to vector<4x4xi32>
    %181 = arith.andi %179, %180 : vector<4x4xi32>
    %182 = vector.extract_strided_slice %181 {offsets = [0, 0], sizes = [4, 1], strides = [1, 1]} : vector<4x4xi32> to vector<4x1xi32>
    %c6 = arith.constant 6 : index
    %c0_43 = arith.constant 0 : index
    %183 = vector.load %arg2[%c6, %c0_43] : memref<108x128xf32, #tpu.memory_space<vmem>>, vector<1x128xf32>
    %c7 = arith.constant 7 : index
    %c0_44 = arith.constant 0 : index
    %184 = vector.load %arg2[%c7, %c0_44] : memref<108x128xf32, #tpu.memory_space<vmem>>, vector<1x128xf32>
    %c8 = arith.constant 8 : index
    %c0_45 = arith.constant 0 : index
    %185 = vector.load %arg2[%c8, %c0_45] : memref<108x128xf32, #tpu.memory_space<vmem>>, vector<1x128xf32>
    %c0_i32_46 = arith.constant 0 : i32
    %186 = vector.broadcast %c0_i32_46 : i32 to vector<4x1xi32>
    %187 = arith.cmpi eq, %182, %186 : vector<4x1xi32>
    %c1_i32_47 = arith.constant 1 : i32
    %188 = vector.broadcast %c1_i32_47 : i32 to vector<4x1xi32>
    %189 = arith.cmpi eq, %182, %188 : vector<4x1xi32>
    %190 = vector.shape_cast %189 : vector<4x1xi1> to vector<4x1xi1>
    %191 = vector.broadcast %190 : vector<4x1xi1> to vector<4x128xi1>
    %192 = vector.shape_cast %184 : vector<1x128xf32> to vector<1x128xf32>
    %193 = vector.broadcast %192 : vector<1x128xf32> to vector<4x128xf32>
    %194 = vector.shape_cast %185 : vector<1x128xf32> to vector<1x128xf32>
    %195 = vector.broadcast %194 : vector<1x128xf32> to vector<4x128xf32>
    %196 = arith.select %191, %193, %195 : vector<4x128xi1>, vector<4x128xf32>
    %197 = vector.shape_cast %187 : vector<4x1xi1> to vector<4x1xi1>
    %198 = vector.broadcast %197 : vector<4x1xi1> to vector<4x128xi1>
    %199 = vector.shape_cast %183 : vector<1x128xf32> to vector<1x128xf32>
    %200 = vector.broadcast %199 : vector<1x128xf32> to vector<4x128xf32>
    %201 = arith.select %198, %200, %196 : vector<4x128xi1>, vector<4x128xf32>
    %202 = arith.addf %177, %201 : vector<4x128xf32>
    %203 = vector.extract_strided_slice %181 {offsets = [0, 1], sizes = [4, 1], strides = [1, 1]} : vector<4x4xi32> to vector<4x1xi32>
    %c33 = arith.constant 33 : index
    %c0_48 = arith.constant 0 : index
    %204 = vector.load %arg2[%c33, %c0_48] : memref<108x128xf32, #tpu.memory_space<vmem>>, vector<1x128xf32>
    %c34 = arith.constant 34 : index
    %c0_49 = arith.constant 0 : index
    %205 = vector.load %arg2[%c34, %c0_49] : memref<108x128xf32, #tpu.memory_space<vmem>>, vector<1x128xf32>
    %c35 = arith.constant 35 : index
    %c0_50 = arith.constant 0 : index
    %206 = vector.load %arg2[%c35, %c0_50] : memref<108x128xf32, #tpu.memory_space<vmem>>, vector<1x128xf32>
    %c0_i32_51 = arith.constant 0 : i32
    %207 = vector.broadcast %c0_i32_51 : i32 to vector<4x1xi32>
    %208 = arith.cmpi eq, %203, %207 : vector<4x1xi32>
    %c1_i32_52 = arith.constant 1 : i32
    %209 = vector.broadcast %c1_i32_52 : i32 to vector<4x1xi32>
    %210 = arith.cmpi eq, %203, %209 : vector<4x1xi32>
    %211 = vector.shape_cast %210 : vector<4x1xi1> to vector<4x1xi1>
    %212 = vector.broadcast %211 : vector<4x1xi1> to vector<4x128xi1>
    %213 = vector.shape_cast %205 : vector<1x128xf32> to vector<1x128xf32>
    %214 = vector.broadcast %213 : vector<1x128xf32> to vector<4x128xf32>
    %215 = vector.shape_cast %206 : vector<1x128xf32> to vector<1x128xf32>
    %216 = vector.broadcast %215 : vector<1x128xf32> to vector<4x128xf32>
    %217 = arith.select %212, %214, %216 : vector<4x128xi1>, vector<4x128xf32>
    %218 = vector.shape_cast %208 : vector<4x1xi1> to vector<4x1xi1>
    %219 = vector.broadcast %218 : vector<4x1xi1> to vector<4x128xi1>
    %220 = vector.shape_cast %204 : vector<1x128xf32> to vector<1x128xf32>
    %221 = vector.broadcast %220 : vector<1x128xf32> to vector<4x128xf32>
    %222 = arith.select %219, %221, %217 : vector<4x128xi1>, vector<4x128xf32>
    %223 = arith.addf %202, %222 : vector<4x128xf32>
    %224 = vector.extract_strided_slice %181 {offsets = [0, 2], sizes = [4, 1], strides = [1, 1]} : vector<4x4xi32> to vector<4x1xi32>
    %c60 = arith.constant 60 : index
    %c0_53 = arith.constant 0 : index
    %225 = vector.load %arg2[%c60, %c0_53] : memref<108x128xf32, #tpu.memory_space<vmem>>, vector<1x128xf32>
    %c61 = arith.constant 61 : index
    %c0_54 = arith.constant 0 : index
    %226 = vector.load %arg2[%c61, %c0_54] : memref<108x128xf32, #tpu.memory_space<vmem>>, vector<1x128xf32>
    %c62 = arith.constant 62 : index
    %c0_55 = arith.constant 0 : index
    %227 = vector.load %arg2[%c62, %c0_55] : memref<108x128xf32, #tpu.memory_space<vmem>>, vector<1x128xf32>
    %c0_i32_56 = arith.constant 0 : i32
    %228 = vector.broadcast %c0_i32_56 : i32 to vector<4x1xi32>
    %229 = arith.cmpi eq, %224, %228 : vector<4x1xi32>
    %c1_i32_57 = arith.constant 1 : i32
    %230 = vector.broadcast %c1_i32_57 : i32 to vector<4x1xi32>
    %231 = arith.cmpi eq, %224, %230 : vector<4x1xi32>
    %232 = vector.shape_cast %231 : vector<4x1xi1> to vector<4x1xi1>
    %233 = vector.broadcast %232 : vector<4x1xi1> to vector<4x128xi1>
    %234 = vector.shape_cast %226 : vector<1x128xf32> to vector<1x128xf32>
    %235 = vector.broadcast %234 : vector<1x128xf32> to vector<4x128xf32>
    %236 = vector.shape_cast %227 : vector<1x128xf32> to vector<1x128xf32>
    %237 = vector.broadcast %236 : vector<1x128xf32> to vector<4x128xf32>
    %238 = arith.select %233, %235, %237 : vector<4x128xi1>, vector<4x128xf32>
    %239 = vector.shape_cast %229 : vector<4x1xi1> to vector<4x1xi1>
    %240 = vector.broadcast %239 : vector<4x1xi1> to vector<4x128xi1>
    %241 = vector.shape_cast %225 : vector<1x128xf32> to vector<1x128xf32>
    %242 = vector.broadcast %241 : vector<1x128xf32> to vector<4x128xf32>
    %243 = arith.select %240, %242, %238 : vector<4x128xi1>, vector<4x128xf32>
    %244 = arith.addf %223, %243 : vector<4x128xf32>
    %245 = vector.extract_strided_slice %181 {offsets = [0, 3], sizes = [4, 1], strides = [1, 1]} : vector<4x4xi32> to vector<4x1xi32>
    %c87 = arith.constant 87 : index
    %c0_58 = arith.constant 0 : index
    %246 = vector.load %arg2[%c87, %c0_58] : memref<108x128xf32, #tpu.memory_space<vmem>>, vector<1x128xf32>
    %c88 = arith.constant 88 : index
    %c0_59 = arith.constant 0 : index
    %247 = vector.load %arg2[%c88, %c0_59] : memref<108x128xf32, #tpu.memory_space<vmem>>, vector<1x128xf32>
    %c89 = arith.constant 89 : index
    %c0_60 = arith.constant 0 : index
    %248 = vector.load %arg2[%c89, %c0_60] : memref<108x128xf32, #tpu.memory_space<vmem>>, vector<1x128xf32>
    %c0_i32_61 = arith.constant 0 : i32
    %249 = vector.broadcast %c0_i32_61 : i32 to vector<4x1xi32>
    %250 = arith.cmpi eq, %245, %249 : vector<4x1xi32>
    %c1_i32_62 = arith.constant 1 : i32
    %251 = vector.broadcast %c1_i32_62 : i32 to vector<4x1xi32>
    %252 = arith.cmpi eq, %245, %251 : vector<4x1xi32>
    %253 = vector.shape_cast %252 : vector<4x1xi1> to vector<4x1xi1>
    %254 = vector.broadcast %253 : vector<4x1xi1> to vector<4x128xi1>
    %255 = vector.shape_cast %247 : vector<1x128xf32> to vector<1x128xf32>
    %256 = vector.broadcast %255 : vector<1x128xf32> to vector<4x128xf32>
    %257 = vector.shape_cast %248 : vector<1x128xf32> to vector<1x128xf32>
    %258 = vector.broadcast %257 : vector<1x128xf32> to vector<4x128xf32>
    %259 = arith.select %254, %256, %258 : vector<4x128xi1>, vector<4x128xf32>
    %260 = vector.shape_cast %250 : vector<4x1xi1> to vector<4x1xi1>
    %261 = vector.broadcast %260 : vector<4x1xi1> to vector<4x128xi1>
    %262 = vector.shape_cast %246 : vector<1x128xf32> to vector<1x128xf32>
    %263 = vector.broadcast %262 : vector<1x128xf32> to vector<4x128xf32>
    %264 = arith.select %261, %263, %259 : vector<4x128xi1>, vector<4x128xf32>
    %265 = arith.addf %244, %264 : vector<4x128xf32>
    %c6_i32 = arith.constant 6 : i32
    %266 = vector.broadcast %c6_i32 : i32 to vector<4x4xi32>
    %267 = arith.shrsi %0, %266 : vector<4x4xi32>
    %c3_i32_63 = arith.constant 3 : i32
    %268 = vector.broadcast %c3_i32_63 : i32 to vector<4x4xi32>
    %269 = arith.andi %267, %268 : vector<4x4xi32>
    %270 = vector.extract_strided_slice %269 {offsets = [0, 0], sizes = [4, 1], strides = [1, 1]} : vector<4x4xi32> to vector<4x1xi32>
    %c9 = arith.constant 9 : index
    %c0_64 = arith.constant 0 : index
    %271 = vector.load %arg2[%c9, %c0_64] : memref<108x128xf32, #tpu.memory_space<vmem>>, vector<1x128xf32>
    %c10 = arith.constant 10 : index
    %c0_65 = arith.constant 0 : index
    %272 = vector.load %arg2[%c10, %c0_65] : memref<108x128xf32, #tpu.memory_space<vmem>>, vector<1x128xf32>
    %c11 = arith.constant 11 : index
    %c0_66 = arith.constant 0 : index
    %273 = vector.load %arg2[%c11, %c0_66] : memref<108x128xf32, #tpu.memory_space<vmem>>, vector<1x128xf32>
    %c0_i32_67 = arith.constant 0 : i32
    %274 = vector.broadcast %c0_i32_67 : i32 to vector<4x1xi32>
    %275 = arith.cmpi eq, %270, %274 : vector<4x1xi32>
    %c1_i32_68 = arith.constant 1 : i32
    %276 = vector.broadcast %c1_i32_68 : i32 to vector<4x1xi32>
    %277 = arith.cmpi eq, %270, %276 : vector<4x1xi32>
    %278 = vector.shape_cast %277 : vector<4x1xi1> to vector<4x1xi1>
    %279 = vector.broadcast %278 : vector<4x1xi1> to vector<4x128xi1>
    %280 = vector.shape_cast %272 : vector<1x128xf32> to vector<1x128xf32>
    %281 = vector.broadcast %280 : vector<1x128xf32> to vector<4x128xf32>
    %282 = vector.shape_cast %273 : vector<1x128xf32> to vector<1x128xf32>
    %283 = vector.broadcast %282 : vector<1x128xf32> to vector<4x128xf32>
    %284 = arith.select %279, %281, %283 : vector<4x128xi1>, vector<4x128xf32>
    %285 = vector.shape_cast %275 : vector<4x1xi1> to vector<4x1xi1>
    %286 = vector.broadcast %285 : vector<4x1xi1> to vector<4x128xi1>
    %287 = vector.shape_cast %271 : vector<1x128xf32> to vector<1x128xf32>
    %288 = vector.broadcast %287 : vector<1x128xf32> to vector<4x128xf32>
    %289 = arith.select %286, %288, %284 : vector<4x128xi1>, vector<4x128xf32>
    %290 = arith.addf %265, %289 : vector<4x128xf32>
    %291 = vector.extract_strided_slice %269 {offsets = [0, 1], sizes = [4, 1], strides = [1, 1]} : vector<4x4xi32> to vector<4x1xi32>
    %c36 = arith.constant 36 : index
    %c0_69 = arith.constant 0 : index
    %292 = vector.load %arg2[%c36, %c0_69] : memref<108x128xf32, #tpu.memory_space<vmem>>, vector<1x128xf32>
    %c37 = arith.constant 37 : index
    %c0_70 = arith.constant 0 : index
    %293 = vector.load %arg2[%c37, %c0_70] : memref<108x128xf32, #tpu.memory_space<vmem>>, vector<1x128xf32>
    %c38 = arith.constant 38 : index
    %c0_71 = arith.constant 0 : index
    %294 = vector.load %arg2[%c38, %c0_71] : memref<108x128xf32, #tpu.memory_space<vmem>>, vector<1x128xf32>
    %c0_i32_72 = arith.constant 0 : i32
    %295 = vector.broadcast %c0_i32_72 : i32 to vector<4x1xi32>
    %296 = arith.cmpi eq, %291, %295 : vector<4x1xi32>
    %c1_i32_73 = arith.constant 1 : i32
    %297 = vector.broadcast %c1_i32_73 : i32 to vector<4x1xi32>
    %298 = arith.cmpi eq, %291, %297 : vector<4x1xi32>
    %299 = vector.shape_cast %298 : vector<4x1xi1> to vector<4x1xi1>
    %300 = vector.broadcast %299 : vector<4x1xi1> to vector<4x128xi1>
    %301 = vector.shape_cast %293 : vector<1x128xf32> to vector<1x128xf32>
    %302 = vector.broadcast %301 : vector<1x128xf32> to vector<4x128xf32>
    %303 = vector.shape_cast %294 : vector<1x128xf32> to vector<1x128xf32>
    %304 = vector.broadcast %303 : vector<1x128xf32> to vector<4x128xf32>
    %305 = arith.select %300, %302, %304 : vector<4x128xi1>, vector<4x128xf32>
    %306 = vector.shape_cast %296 : vector<4x1xi1> to vector<4x1xi1>
    %307 = vector.broadcast %306 : vector<4x1xi1> to vector<4x128xi1>
    %308 = vector.shape_cast %292 : vector<1x128xf32> to vector<1x128xf32>
    %309 = vector.broadcast %308 : vector<1x128xf32> to vector<4x128xf32>
    %310 = arith.select %307, %309, %305 : vector<4x128xi1>, vector<4x128xf32>
    %311 = arith.addf %290, %310 : vector<4x128xf32>
    %312 = vector.extract_strided_slice %269 {offsets = [0, 2], sizes = [4, 1], strides = [1, 1]} : vector<4x4xi32> to vector<4x1xi32>
    %c63 = arith.constant 63 : index
    %c0_74 = arith.constant 0 : index
    %313 = vector.load %arg2[%c63, %c0_74] : memref<108x128xf32, #tpu.memory_space<vmem>>, vector<1x128xf32>
    %c64 = arith.constant 64 : index
    %c0_75 = arith.constant 0 : index
    %314 = vector.load %arg2[%c64, %c0_75] : memref<108x128xf32, #tpu.memory_space<vmem>>, vector<1x128xf32>
    %c65 = arith.constant 65 : index
    %c0_76 = arith.constant 0 : index
    %315 = vector.load %arg2[%c65, %c0_76] : memref<108x128xf32, #tpu.memory_space<vmem>>, vector<1x128xf32>
    %c0_i32_77 = arith.constant 0 : i32
    %316 = vector.broadcast %c0_i32_77 : i32 to vector<4x1xi32>
    %317 = arith.cmpi eq, %312, %316 : vector<4x1xi32>
    %c1_i32_78 = arith.constant 1 : i32
    %318 = vector.broadcast %c1_i32_78 : i32 to vector<4x1xi32>
    %319 = arith.cmpi eq, %312, %318 : vector<4x1xi32>
    %320 = vector.shape_cast %319 : vector<4x1xi1> to vector<4x1xi1>
    %321 = vector.broadcast %320 : vector<4x1xi1> to vector<4x128xi1>
    %322 = vector.shape_cast %314 : vector<1x128xf32> to vector<1x128xf32>
    %323 = vector.broadcast %322 : vector<1x128xf32> to vector<4x128xf32>
    %324 = vector.shape_cast %315 : vector<1x128xf32> to vector<1x128xf32>
    %325 = vector.broadcast %324 : vector<1x128xf32> to vector<4x128xf32>
    %326 = arith.select %321, %323, %325 : vector<4x128xi1>, vector<4x128xf32>
    %327 = vector.shape_cast %317 : vector<4x1xi1> to vector<4x1xi1>
    %328 = vector.broadcast %327 : vector<4x1xi1> to vector<4x128xi1>
    %329 = vector.shape_cast %313 : vector<1x128xf32> to vector<1x128xf32>
    %330 = vector.broadcast %329 : vector<1x128xf32> to vector<4x128xf32>
    %331 = arith.select %328, %330, %326 : vector<4x128xi1>, vector<4x128xf32>
    %332 = arith.addf %311, %331 : vector<4x128xf32>
    %333 = vector.extract_strided_slice %269 {offsets = [0, 3], sizes = [4, 1], strides = [1, 1]} : vector<4x4xi32> to vector<4x1xi32>
    %c90 = arith.constant 90 : index
    %c0_79 = arith.constant 0 : index
    %334 = vector.load %arg2[%c90, %c0_79] : memref<108x128xf32, #tpu.memory_space<vmem>>, vector<1x128xf32>
    %c91 = arith.constant 91 : index
    %c0_80 = arith.constant 0 : index
    %335 = vector.load %arg2[%c91, %c0_80] : memref<108x128xf32, #tpu.memory_space<vmem>>, vector<1x128xf32>
    %c92 = arith.constant 92 : index
    %c0_81 = arith.constant 0 : index
    %336 = vector.load %arg2[%c92, %c0_81] : memref<108x128xf32, #tpu.memory_space<vmem>>, vector<1x128xf32>
    %c0_i32_82 = arith.constant 0 : i32
    %337 = vector.broadcast %c0_i32_82 : i32 to vector<4x1xi32>
    %338 = arith.cmpi eq, %333, %337 : vector<4x1xi32>
    %c1_i32_83 = arith.constant 1 : i32
    %339 = vector.broadcast %c1_i32_83 : i32 to vector<4x1xi32>
    %340 = arith.cmpi eq, %333, %339 : vector<4x1xi32>
    %341 = vector.shape_cast %340 : vector<4x1xi1> to vector<4x1xi1>
    %342 = vector.broadcast %341 : vector<4x1xi1> to vector<4x128xi1>
    %343 = vector.shape_cast %335 : vector<1x128xf32> to vector<1x128xf32>
    %344 = vector.broadcast %343 : vector<1x128xf32> to vector<4x128xf32>
    %345 = vector.shape_cast %336 : vector<1x128xf32> to vector<1x128xf32>
    %346 = vector.broadcast %345 : vector<1x128xf32> to vector<4x128xf32>
    %347 = arith.select %342, %344, %346 : vector<4x128xi1>, vector<4x128xf32>
    %348 = vector.shape_cast %338 : vector<4x1xi1> to vector<4x1xi1>
    %349 = vector.broadcast %348 : vector<4x1xi1> to vector<4x128xi1>
    %350 = vector.shape_cast %334 : vector<1x128xf32> to vector<1x128xf32>
    %351 = vector.broadcast %350 : vector<1x128xf32> to vector<4x128xf32>
    %352 = arith.select %349, %351, %347 : vector<4x128xi1>, vector<4x128xf32>
    %353 = arith.addf %332, %352 : vector<4x128xf32>
    %c8_i32 = arith.constant 8 : i32
    %354 = vector.broadcast %c8_i32 : i32 to vector<4x4xi32>
    %355 = arith.shrsi %0, %354 : vector<4x4xi32>
    %c3_i32_84 = arith.constant 3 : i32
    %356 = vector.broadcast %c3_i32_84 : i32 to vector<4x4xi32>
    %357 = arith.andi %355, %356 : vector<4x4xi32>
    %358 = vector.extract_strided_slice %357 {offsets = [0, 0], sizes = [4, 1], strides = [1, 1]} : vector<4x4xi32> to vector<4x1xi32>
    %c12 = arith.constant 12 : index
    %c0_85 = arith.constant 0 : index
    %359 = vector.load %arg2[%c12, %c0_85] : memref<108x128xf32, #tpu.memory_space<vmem>>, vector<1x128xf32>
    %c13 = arith.constant 13 : index
    %c0_86 = arith.constant 0 : index
    %360 = vector.load %arg2[%c13, %c0_86] : memref<108x128xf32, #tpu.memory_space<vmem>>, vector<1x128xf32>
    %c14 = arith.constant 14 : index
    %c0_87 = arith.constant 0 : index
    %361 = vector.load %arg2[%c14, %c0_87] : memref<108x128xf32, #tpu.memory_space<vmem>>, vector<1x128xf32>
    %c0_i32_88 = arith.constant 0 : i32
    %362 = vector.broadcast %c0_i32_88 : i32 to vector<4x1xi32>
    %363 = arith.cmpi eq, %358, %362 : vector<4x1xi32>
    %c1_i32_89 = arith.constant 1 : i32
    %364 = vector.broadcast %c1_i32_89 : i32 to vector<4x1xi32>
    %365 = arith.cmpi eq, %358, %364 : vector<4x1xi32>
    %366 = vector.shape_cast %365 : vector<4x1xi1> to vector<4x1xi1>
    %367 = vector.broadcast %366 : vector<4x1xi1> to vector<4x128xi1>
    %368 = vector.shape_cast %360 : vector<1x128xf32> to vector<1x128xf32>
    %369 = vector.broadcast %368 : vector<1x128xf32> to vector<4x128xf32>
    %370 = vector.shape_cast %361 : vector<1x128xf32> to vector<1x128xf32>
    %371 = vector.broadcast %370 : vector<1x128xf32> to vector<4x128xf32>
    %372 = arith.select %367, %369, %371 : vector<4x128xi1>, vector<4x128xf32>
    %373 = vector.shape_cast %363 : vector<4x1xi1> to vector<4x1xi1>
    %374 = vector.broadcast %373 : vector<4x1xi1> to vector<4x128xi1>
    %375 = vector.shape_cast %359 : vector<1x128xf32> to vector<1x128xf32>
    %376 = vector.broadcast %375 : vector<1x128xf32> to vector<4x128xf32>
    %377 = arith.select %374, %376, %372 : vector<4x128xi1>, vector<4x128xf32>
    %378 = arith.addf %353, %377 : vector<4x128xf32>
    %379 = vector.extract_strided_slice %357 {offsets = [0, 1], sizes = [4, 1], strides = [1, 1]} : vector<4x4xi32> to vector<4x1xi32>
    %c39 = arith.constant 39 : index
    %c0_90 = arith.constant 0 : index
    %380 = vector.load %arg2[%c39, %c0_90] : memref<108x128xf32, #tpu.memory_space<vmem>>, vector<1x128xf32>
    %c40 = arith.constant 40 : index
    %c0_91 = arith.constant 0 : index
    %381 = vector.load %arg2[%c40, %c0_91] : memref<108x128xf32, #tpu.memory_space<vmem>>, vector<1x128xf32>
    %c41 = arith.constant 41 : index
    %c0_92 = arith.constant 0 : index
    %382 = vector.load %arg2[%c41, %c0_92] : memref<108x128xf32, #tpu.memory_space<vmem>>, vector<1x128xf32>
    %c0_i32_93 = arith.constant 0 : i32
    %383 = vector.broadcast %c0_i32_93 : i32 to vector<4x1xi32>
    %384 = arith.cmpi eq, %379, %383 : vector<4x1xi32>
    %c1_i32_94 = arith.constant 1 : i32
    %385 = vector.broadcast %c1_i32_94 : i32 to vector<4x1xi32>
    %386 = arith.cmpi eq, %379, %385 : vector<4x1xi32>
    %387 = vector.shape_cast %386 : vector<4x1xi1> to vector<4x1xi1>
    %388 = vector.broadcast %387 : vector<4x1xi1> to vector<4x128xi1>
    %389 = vector.shape_cast %381 : vector<1x128xf32> to vector<1x128xf32>
    %390 = vector.broadcast %389 : vector<1x128xf32> to vector<4x128xf32>
    %391 = vector.shape_cast %382 : vector<1x128xf32> to vector<1x128xf32>
    %392 = vector.broadcast %391 : vector<1x128xf32> to vector<4x128xf32>
    %393 = arith.select %388, %390, %392 : vector<4x128xi1>, vector<4x128xf32>
    %394 = vector.shape_cast %384 : vector<4x1xi1> to vector<4x1xi1>
    %395 = vector.broadcast %394 : vector<4x1xi1> to vector<4x128xi1>
    %396 = vector.shape_cast %380 : vector<1x128xf32> to vector<1x128xf32>
    %397 = vector.broadcast %396 : vector<1x128xf32> to vector<4x128xf32>
    %398 = arith.select %395, %397, %393 : vector<4x128xi1>, vector<4x128xf32>
    %399 = arith.addf %378, %398 : vector<4x128xf32>
    %400 = vector.extract_strided_slice %357 {offsets = [0, 2], sizes = [4, 1], strides = [1, 1]} : vector<4x4xi32> to vector<4x1xi32>
    %c66 = arith.constant 66 : index
    %c0_95 = arith.constant 0 : index
    %401 = vector.load %arg2[%c66, %c0_95] : memref<108x128xf32, #tpu.memory_space<vmem>>, vector<1x128xf32>
    %c67 = arith.constant 67 : index
    %c0_96 = arith.constant 0 : index
    %402 = vector.load %arg2[%c67, %c0_96] : memref<108x128xf32, #tpu.memory_space<vmem>>, vector<1x128xf32>
    %c68 = arith.constant 68 : index
    %c0_97 = arith.constant 0 : index
    %403 = vector.load %arg2[%c68, %c0_97] : memref<108x128xf32, #tpu.memory_space<vmem>>, vector<1x128xf32>
    %c0_i32_98 = arith.constant 0 : i32
    %404 = vector.broadcast %c0_i32_98 : i32 to vector<4x1xi32>
    %405 = arith.cmpi eq, %400, %404 : vector<4x1xi32>
    %c1_i32_99 = arith.constant 1 : i32
    %406 = vector.broadcast %c1_i32_99 : i32 to vector<4x1xi32>
    %407 = arith.cmpi eq, %400, %406 : vector<4x1xi32>
    %408 = vector.shape_cast %407 : vector<4x1xi1> to vector<4x1xi1>
    %409 = vector.broadcast %408 : vector<4x1xi1> to vector<4x128xi1>
    %410 = vector.shape_cast %402 : vector<1x128xf32> to vector<1x128xf32>
    %411 = vector.broadcast %410 : vector<1x128xf32> to vector<4x128xf32>
    %412 = vector.shape_cast %403 : vector<1x128xf32> to vector<1x128xf32>
    %413 = vector.broadcast %412 : vector<1x128xf32> to vector<4x128xf32>
    %414 = arith.select %409, %411, %413 : vector<4x128xi1>, vector<4x128xf32>
    %415 = vector.shape_cast %405 : vector<4x1xi1> to vector<4x1xi1>
    %416 = vector.broadcast %415 : vector<4x1xi1> to vector<4x128xi1>
    %417 = vector.shape_cast %401 : vector<1x128xf32> to vector<1x128xf32>
    %418 = vector.broadcast %417 : vector<1x128xf32> to vector<4x128xf32>
    %419 = arith.select %416, %418, %414 : vector<4x128xi1>, vector<4x128xf32>
    %420 = arith.addf %399, %419 : vector<4x128xf32>
    %421 = vector.extract_strided_slice %357 {offsets = [0, 3], sizes = [4, 1], strides = [1, 1]} : vector<4x4xi32> to vector<4x1xi32>
    %c93 = arith.constant 93 : index
    %c0_100 = arith.constant 0 : index
    %422 = vector.load %arg2[%c93, %c0_100] : memref<108x128xf32, #tpu.memory_space<vmem>>, vector<1x128xf32>
    %c94 = arith.constant 94 : index
    %c0_101 = arith.constant 0 : index
    %423 = vector.load %arg2[%c94, %c0_101] : memref<108x128xf32, #tpu.memory_space<vmem>>, vector<1x128xf32>
    %c95 = arith.constant 95 : index
    %c0_102 = arith.constant 0 : index
    %424 = vector.load %arg2[%c95, %c0_102] : memref<108x128xf32, #tpu.memory_space<vmem>>, vector<1x128xf32>
    %c0_i32_103 = arith.constant 0 : i32
    %425 = vector.broadcast %c0_i32_103 : i32 to vector<4x1xi32>
    %426 = arith.cmpi eq, %421, %425 : vector<4x1xi32>
    %c1_i32_104 = arith.constant 1 : i32
    %427 = vector.broadcast %c1_i32_104 : i32 to vector<4x1xi32>
    %428 = arith.cmpi eq, %421, %427 : vector<4x1xi32>
    %429 = vector.shape_cast %428 : vector<4x1xi1> to vector<4x1xi1>
    %430 = vector.broadcast %429 : vector<4x1xi1> to vector<4x128xi1>
    %431 = vector.shape_cast %423 : vector<1x128xf32> to vector<1x128xf32>
    %432 = vector.broadcast %431 : vector<1x128xf32> to vector<4x128xf32>
    %433 = vector.shape_cast %424 : vector<1x128xf32> to vector<1x128xf32>
    %434 = vector.broadcast %433 : vector<1x128xf32> to vector<4x128xf32>
    %435 = arith.select %430, %432, %434 : vector<4x128xi1>, vector<4x128xf32>
    %436 = vector.shape_cast %426 : vector<4x1xi1> to vector<4x1xi1>
    %437 = vector.broadcast %436 : vector<4x1xi1> to vector<4x128xi1>
    %438 = vector.shape_cast %422 : vector<1x128xf32> to vector<1x128xf32>
    %439 = vector.broadcast %438 : vector<1x128xf32> to vector<4x128xf32>
    %440 = arith.select %437, %439, %435 : vector<4x128xi1>, vector<4x128xf32>
    %441 = arith.addf %420, %440 : vector<4x128xf32>
    %c10_i32 = arith.constant 10 : i32
    %442 = vector.broadcast %c10_i32 : i32 to vector<4x4xi32>
    %443 = arith.shrsi %0, %442 : vector<4x4xi32>
    %c3_i32_105 = arith.constant 3 : i32
    %444 = vector.broadcast %c3_i32_105 : i32 to vector<4x4xi32>
    %445 = arith.andi %443, %444 : vector<4x4xi32>
    %446 = vector.extract_strided_slice %445 {offsets = [0, 0], sizes = [4, 1], strides = [1, 1]} : vector<4x4xi32> to vector<4x1xi32>
    %c15 = arith.constant 15 : index
    %c0_106 = arith.constant 0 : index
    %447 = vector.load %arg2[%c15, %c0_106] : memref<108x128xf32, #tpu.memory_space<vmem>>, vector<1x128xf32>
    %c16 = arith.constant 16 : index
    %c0_107 = arith.constant 0 : index
    %448 = vector.load %arg2[%c16, %c0_107] : memref<108x128xf32, #tpu.memory_space<vmem>>, vector<1x128xf32>
    %c17 = arith.constant 17 : index
    %c0_108 = arith.constant 0 : index
    %449 = vector.load %arg2[%c17, %c0_108] : memref<108x128xf32, #tpu.memory_space<vmem>>, vector<1x128xf32>
    %c0_i32_109 = arith.constant 0 : i32
    %450 = vector.broadcast %c0_i32_109 : i32 to vector<4x1xi32>
    %451 = arith.cmpi eq, %446, %450 : vector<4x1xi32>
    %c1_i32_110 = arith.constant 1 : i32
    %452 = vector.broadcast %c1_i32_110 : i32 to vector<4x1xi32>
    %453 = arith.cmpi eq, %446, %452 : vector<4x1xi32>
    %454 = vector.shape_cast %453 : vector<4x1xi1> to vector<4x1xi1>
    %455 = vector.broadcast %454 : vector<4x1xi1> to vector<4x128xi1>
    %456 = vector.shape_cast %448 : vector<1x128xf32> to vector<1x128xf32>
    %457 = vector.broadcast %456 : vector<1x128xf32> to vector<4x128xf32>
    %458 = vector.shape_cast %449 : vector<1x128xf32> to vector<1x128xf32>
    %459 = vector.broadcast %458 : vector<1x128xf32> to vector<4x128xf32>
    %460 = arith.select %455, %457, %459 : vector<4x128xi1>, vector<4x128xf32>
    %461 = vector.shape_cast %451 : vector<4x1xi1> to vector<4x1xi1>
    %462 = vector.broadcast %461 : vector<4x1xi1> to vector<4x128xi1>
    %463 = vector.shape_cast %447 : vector<1x128xf32> to vector<1x128xf32>
    %464 = vector.broadcast %463 : vector<1x128xf32> to vector<4x128xf32>
    %465 = arith.select %462, %464, %460 : vector<4x128xi1>, vector<4x128xf32>
    %466 = arith.addf %441, %465 : vector<4x128xf32>
    %467 = vector.extract_strided_slice %445 {offsets = [0, 1], sizes = [4, 1], strides = [1, 1]} : vector<4x4xi32> to vector<4x1xi32>
    %c42 = arith.constant 42 : index
    %c0_111 = arith.constant 0 : index
    %468 = vector.load %arg2[%c42, %c0_111] : memref<108x128xf32, #tpu.memory_space<vmem>>, vector<1x128xf32>
    %c43 = arith.constant 43 : index
    %c0_112 = arith.constant 0 : index
    %469 = vector.load %arg2[%c43, %c0_112] : memref<108x128xf32, #tpu.memory_space<vmem>>, vector<1x128xf32>
    %c44 = arith.constant 44 : index
    %c0_113 = arith.constant 0 : index
    %470 = vector.load %arg2[%c44, %c0_113] : memref<108x128xf32, #tpu.memory_space<vmem>>, vector<1x128xf32>
    %c0_i32_114 = arith.constant 0 : i32
    %471 = vector.broadcast %c0_i32_114 : i32 to vector<4x1xi32>
    %472 = arith.cmpi eq, %467, %471 : vector<4x1xi32>
    %c1_i32_115 = arith.constant 1 : i32
    %473 = vector.broadcast %c1_i32_115 : i32 to vector<4x1xi32>
    %474 = arith.cmpi eq, %467, %473 : vector<4x1xi32>
    %475 = vector.shape_cast %474 : vector<4x1xi1> to vector<4x1xi1>
    %476 = vector.broadcast %475 : vector<4x1xi1> to vector<4x128xi1>
    %477 = vector.shape_cast %469 : vector<1x128xf32> to vector<1x128xf32>
    %478 = vector.broadcast %477 : vector<1x128xf32> to vector<4x128xf32>
    %479 = vector.shape_cast %470 : vector<1x128xf32> to vector<1x128xf32>
    %480 = vector.broadcast %479 : vector<1x128xf32> to vector<4x128xf32>
    %481 = arith.select %476, %478, %480 : vector<4x128xi1>, vector<4x128xf32>
    %482 = vector.shape_cast %472 : vector<4x1xi1> to vector<4x1xi1>
    %483 = vector.broadcast %482 : vector<4x1xi1> to vector<4x128xi1>
    %484 = vector.shape_cast %468 : vector<1x128xf32> to vector<1x128xf32>
    %485 = vector.broadcast %484 : vector<1x128xf32> to vector<4x128xf32>
    %486 = arith.select %483, %485, %481 : vector<4x128xi1>, vector<4x128xf32>
    %487 = arith.addf %466, %486 : vector<4x128xf32>
    %488 = vector.extract_strided_slice %445 {offsets = [0, 2], sizes = [4, 1], strides = [1, 1]} : vector<4x4xi32> to vector<4x1xi32>
    %c69 = arith.constant 69 : index
    %c0_116 = arith.constant 0 : index
    %489 = vector.load %arg2[%c69, %c0_116] : memref<108x128xf32, #tpu.memory_space<vmem>>, vector<1x128xf32>
    %c70 = arith.constant 70 : index
    %c0_117 = arith.constant 0 : index
    %490 = vector.load %arg2[%c70, %c0_117] : memref<108x128xf32, #tpu.memory_space<vmem>>, vector<1x128xf32>
    %c71 = arith.constant 71 : index
    %c0_118 = arith.constant 0 : index
    %491 = vector.load %arg2[%c71, %c0_118] : memref<108x128xf32, #tpu.memory_space<vmem>>, vector<1x128xf32>
    %c0_i32_119 = arith.constant 0 : i32
    %492 = vector.broadcast %c0_i32_119 : i32 to vector<4x1xi32>
    %493 = arith.cmpi eq, %488, %492 : vector<4x1xi32>
    %c1_i32_120 = arith.constant 1 : i32
    %494 = vector.broadcast %c1_i32_120 : i32 to vector<4x1xi32>
    %495 = arith.cmpi eq, %488, %494 : vector<4x1xi32>
    %496 = vector.shape_cast %495 : vector<4x1xi1> to vector<4x1xi1>
    %497 = vector.broadcast %496 : vector<4x1xi1> to vector<4x128xi1>
    %498 = vector.shape_cast %490 : vector<1x128xf32> to vector<1x128xf32>
    %499 = vector.broadcast %498 : vector<1x128xf32> to vector<4x128xf32>
    %500 = vector.shape_cast %491 : vector<1x128xf32> to vector<1x128xf32>
    %501 = vector.broadcast %500 : vector<1x128xf32> to vector<4x128xf32>
    %502 = arith.select %497, %499, %501 : vector<4x128xi1>, vector<4x128xf32>
    %503 = vector.shape_cast %493 : vector<4x1xi1> to vector<4x1xi1>
    %504 = vector.broadcast %503 : vector<4x1xi1> to vector<4x128xi1>
    %505 = vector.shape_cast %489 : vector<1x128xf32> to vector<1x128xf32>
    %506 = vector.broadcast %505 : vector<1x128xf32> to vector<4x128xf32>
    %507 = arith.select %504, %506, %502 : vector<4x128xi1>, vector<4x128xf32>
    %508 = arith.addf %487, %507 : vector<4x128xf32>
    %509 = vector.extract_strided_slice %445 {offsets = [0, 3], sizes = [4, 1], strides = [1, 1]} : vector<4x4xi32> to vector<4x1xi32>
    %c96 = arith.constant 96 : index
    %c0_121 = arith.constant 0 : index
    %510 = vector.load %arg2[%c96, %c0_121] : memref<108x128xf32, #tpu.memory_space<vmem>>, vector<1x128xf32>
    %c97 = arith.constant 97 : index
    %c0_122 = arith.constant 0 : index
    %511 = vector.load %arg2[%c97, %c0_122] : memref<108x128xf32, #tpu.memory_space<vmem>>, vector<1x128xf32>
    %c98 = arith.constant 98 : index
    %c0_123 = arith.constant 0 : index
    %512 = vector.load %arg2[%c98, %c0_123] : memref<108x128xf32, #tpu.memory_space<vmem>>, vector<1x128xf32>
    %c0_i32_124 = arith.constant 0 : i32
    %513 = vector.broadcast %c0_i32_124 : i32 to vector<4x1xi32>
    %514 = arith.cmpi eq, %509, %513 : vector<4x1xi32>
    %c1_i32_125 = arith.constant 1 : i32
    %515 = vector.broadcast %c1_i32_125 : i32 to vector<4x1xi32>
    %516 = arith.cmpi eq, %509, %515 : vector<4x1xi32>
    %517 = vector.shape_cast %516 : vector<4x1xi1> to vector<4x1xi1>
    %518 = vector.broadcast %517 : vector<4x1xi1> to vector<4x128xi1>
    %519 = vector.shape_cast %511 : vector<1x128xf32> to vector<1x128xf32>
    %520 = vector.broadcast %519 : vector<1x128xf32> to vector<4x128xf32>
    %521 = vector.shape_cast %512 : vector<1x128xf32> to vector<1x128xf32>
    %522 = vector.broadcast %521 : vector<1x128xf32> to vector<4x128xf32>
    %523 = arith.select %518, %520, %522 : vector<4x128xi1>, vector<4x128xf32>
    %524 = vector.shape_cast %514 : vector<4x1xi1> to vector<4x1xi1>
    %525 = vector.broadcast %524 : vector<4x1xi1> to vector<4x128xi1>
    %526 = vector.shape_cast %510 : vector<1x128xf32> to vector<1x128xf32>
    %527 = vector.broadcast %526 : vector<1x128xf32> to vector<4x128xf32>
    %528 = arith.select %525, %527, %523 : vector<4x128xi1>, vector<4x128xf32>
    %529 = arith.addf %508, %528 : vector<4x128xf32>
    %c12_i32 = arith.constant 12 : i32
    %530 = vector.broadcast %c12_i32 : i32 to vector<4x4xi32>
    %531 = arith.shrsi %0, %530 : vector<4x4xi32>
    %c3_i32_126 = arith.constant 3 : i32
    %532 = vector.broadcast %c3_i32_126 : i32 to vector<4x4xi32>
    %533 = arith.andi %531, %532 : vector<4x4xi32>
    %534 = vector.extract_strided_slice %533 {offsets = [0, 0], sizes = [4, 1], strides = [1, 1]} : vector<4x4xi32> to vector<4x1xi32>
    %c18 = arith.constant 18 : index
    %c0_127 = arith.constant 0 : index
    %535 = vector.load %arg2[%c18, %c0_127] : memref<108x128xf32, #tpu.memory_space<vmem>>, vector<1x128xf32>
    %c19 = arith.constant 19 : index
    %c0_128 = arith.constant 0 : index
    %536 = vector.load %arg2[%c19, %c0_128] : memref<108x128xf32, #tpu.memory_space<vmem>>, vector<1x128xf32>
    %c20 = arith.constant 20 : index
    %c0_129 = arith.constant 0 : index
    %537 = vector.load %arg2[%c20, %c0_129] : memref<108x128xf32, #tpu.memory_space<vmem>>, vector<1x128xf32>
    %c0_i32_130 = arith.constant 0 : i32
    %538 = vector.broadcast %c0_i32_130 : i32 to vector<4x1xi32>
    %539 = arith.cmpi eq, %534, %538 : vector<4x1xi32>
    %c1_i32_131 = arith.constant 1 : i32
    %540 = vector.broadcast %c1_i32_131 : i32 to vector<4x1xi32>
    %541 = arith.cmpi eq, %534, %540 : vector<4x1xi32>
    %542 = vector.shape_cast %541 : vector<4x1xi1> to vector<4x1xi1>
    %543 = vector.broadcast %542 : vector<4x1xi1> to vector<4x128xi1>
    %544 = vector.shape_cast %536 : vector<1x128xf32> to vector<1x128xf32>
    %545 = vector.broadcast %544 : vector<1x128xf32> to vector<4x128xf32>
    %546 = vector.shape_cast %537 : vector<1x128xf32> to vector<1x128xf32>
    %547 = vector.broadcast %546 : vector<1x128xf32> to vector<4x128xf32>
    %548 = arith.select %543, %545, %547 : vector<4x128xi1>, vector<4x128xf32>
    %549 = vector.shape_cast %539 : vector<4x1xi1> to vector<4x1xi1>
    %550 = vector.broadcast %549 : vector<4x1xi1> to vector<4x128xi1>
    %551 = vector.shape_cast %535 : vector<1x128xf32> to vector<1x128xf32>
    %552 = vector.broadcast %551 : vector<1x128xf32> to vector<4x128xf32>
    %553 = arith.select %550, %552, %548 : vector<4x128xi1>, vector<4x128xf32>
    %554 = arith.addf %529, %553 : vector<4x128xf32>
    %555 = vector.extract_strided_slice %533 {offsets = [0, 1], sizes = [4, 1], strides = [1, 1]} : vector<4x4xi32> to vector<4x1xi32>
    %c45 = arith.constant 45 : index
    %c0_132 = arith.constant 0 : index
    %556 = vector.load %arg2[%c45, %c0_132] : memref<108x128xf32, #tpu.memory_space<vmem>>, vector<1x128xf32>
    %c46 = arith.constant 46 : index
    %c0_133 = arith.constant 0 : index
    %557 = vector.load %arg2[%c46, %c0_133] : memref<108x128xf32, #tpu.memory_space<vmem>>, vector<1x128xf32>
    %c47 = arith.constant 47 : index
    %c0_134 = arith.constant 0 : index
    %558 = vector.load %arg2[%c47, %c0_134] : memref<108x128xf32, #tpu.memory_space<vmem>>, vector<1x128xf32>
    %c0_i32_135 = arith.constant 0 : i32
    %559 = vector.broadcast %c0_i32_135 : i32 to vector<4x1xi32>
    %560 = arith.cmpi eq, %555, %559 : vector<4x1xi32>
    %c1_i32_136 = arith.constant 1 : i32
    %561 = vector.broadcast %c1_i32_136 : i32 to vector<4x1xi32>
    %562 = arith.cmpi eq, %555, %561 : vector<4x1xi32>
    %563 = vector.shape_cast %562 : vector<4x1xi1> to vector<4x1xi1>
    %564 = vector.broadcast %563 : vector<4x1xi1> to vector<4x128xi1>
    %565 = vector.shape_cast %557 : vector<1x128xf32> to vector<1x128xf32>
    %566 = vector.broadcast %565 : vector<1x128xf32> to vector<4x128xf32>
    %567 = vector.shape_cast %558 : vector<1x128xf32> to vector<1x128xf32>
    %568 = vector.broadcast %567 : vector<1x128xf32> to vector<4x128xf32>
    %569 = arith.select %564, %566, %568 : vector<4x128xi1>, vector<4x128xf32>
    %570 = vector.shape_cast %560 : vector<4x1xi1> to vector<4x1xi1>
    %571 = vector.broadcast %570 : vector<4x1xi1> to vector<4x128xi1>
    %572 = vector.shape_cast %556 : vector<1x128xf32> to vector<1x128xf32>
    %573 = vector.broadcast %572 : vector<1x128xf32> to vector<4x128xf32>
    %574 = arith.select %571, %573, %569 : vector<4x128xi1>, vector<4x128xf32>
    %575 = arith.addf %554, %574 : vector<4x128xf32>
    %576 = vector.extract_strided_slice %533 {offsets = [0, 2], sizes = [4, 1], strides = [1, 1]} : vector<4x4xi32> to vector<4x1xi32>
    %c72 = arith.constant 72 : index
    %c0_137 = arith.constant 0 : index
    %577 = vector.load %arg2[%c72, %c0_137] : memref<108x128xf32, #tpu.memory_space<vmem>>, vector<1x128xf32>
    %c73 = arith.constant 73 : index
    %c0_138 = arith.constant 0 : index
    %578 = vector.load %arg2[%c73, %c0_138] : memref<108x128xf32, #tpu.memory_space<vmem>>, vector<1x128xf32>
    %c74 = arith.constant 74 : index
    %c0_139 = arith.constant 0 : index
    %579 = vector.load %arg2[%c74, %c0_139] : memref<108x128xf32, #tpu.memory_space<vmem>>, vector<1x128xf32>
    %c0_i32_140 = arith.constant 0 : i32
    %580 = vector.broadcast %c0_i32_140 : i32 to vector<4x1xi32>
    %581 = arith.cmpi eq, %576, %580 : vector<4x1xi32>
    %c1_i32_141 = arith.constant 1 : i32
    %582 = vector.broadcast %c1_i32_141 : i32 to vector<4x1xi32>
    %583 = arith.cmpi eq, %576, %582 : vector<4x1xi32>
    %584 = vector.shape_cast %583 : vector<4x1xi1> to vector<4x1xi1>
    %585 = vector.broadcast %584 : vector<4x1xi1> to vector<4x128xi1>
    %586 = vector.shape_cast %578 : vector<1x128xf32> to vector<1x128xf32>
    %587 = vector.broadcast %586 : vector<1x128xf32> to vector<4x128xf32>
    %588 = vector.shape_cast %579 : vector<1x128xf32> to vector<1x128xf32>
    %589 = vector.broadcast %588 : vector<1x128xf32> to vector<4x128xf32>
    %590 = arith.select %585, %587, %589 : vector<4x128xi1>, vector<4x128xf32>
    %591 = vector.shape_cast %581 : vector<4x1xi1> to vector<4x1xi1>
    %592 = vector.broadcast %591 : vector<4x1xi1> to vector<4x128xi1>
    %593 = vector.shape_cast %577 : vector<1x128xf32> to vector<1x128xf32>
    %594 = vector.broadcast %593 : vector<1x128xf32> to vector<4x128xf32>
    %595 = arith.select %592, %594, %590 : vector<4x128xi1>, vector<4x128xf32>
    %596 = arith.addf %575, %595 : vector<4x128xf32>
    %597 = vector.extract_strided_slice %533 {offsets = [0, 3], sizes = [4, 1], strides = [1, 1]} : vector<4x4xi32> to vector<4x1xi32>
    %c99 = arith.constant 99 : index
    %c0_142 = arith.constant 0 : index
    %598 = vector.load %arg2[%c99, %c0_142] : memref<108x128xf32, #tpu.memory_space<vmem>>, vector<1x128xf32>
    %c100 = arith.constant 100 : index
    %c0_143 = arith.constant 0 : index
    %599 = vector.load %arg2[%c100, %c0_143] : memref<108x128xf32, #tpu.memory_space<vmem>>, vector<1x128xf32>
    %c101 = arith.constant 101 : index
    %c0_144 = arith.constant 0 : index
    %600 = vector.load %arg2[%c101, %c0_144] : memref<108x128xf32, #tpu.memory_space<vmem>>, vector<1x128xf32>
    %c0_i32_145 = arith.constant 0 : i32
    %601 = vector.broadcast %c0_i32_145 : i32 to vector<4x1xi32>
    %602 = arith.cmpi eq, %597, %601 : vector<4x1xi32>
    %c1_i32_146 = arith.constant 1 : i32
    %603 = vector.broadcast %c1_i32_146 : i32 to vector<4x1xi32>
    %604 = arith.cmpi eq, %597, %603 : vector<4x1xi32>
    %605 = vector.shape_cast %604 : vector<4x1xi1> to vector<4x1xi1>
    %606 = vector.broadcast %605 : vector<4x1xi1> to vector<4x128xi1>
    %607 = vector.shape_cast %599 : vector<1x128xf32> to vector<1x128xf32>
    %608 = vector.broadcast %607 : vector<1x128xf32> to vector<4x128xf32>
    %609 = vector.shape_cast %600 : vector<1x128xf32> to vector<1x128xf32>
    %610 = vector.broadcast %609 : vector<1x128xf32> to vector<4x128xf32>
    %611 = arith.select %606, %608, %610 : vector<4x128xi1>, vector<4x128xf32>
    %612 = vector.shape_cast %602 : vector<4x1xi1> to vector<4x1xi1>
    %613 = vector.broadcast %612 : vector<4x1xi1> to vector<4x128xi1>
    %614 = vector.shape_cast %598 : vector<1x128xf32> to vector<1x128xf32>
    %615 = vector.broadcast %614 : vector<1x128xf32> to vector<4x128xf32>
    %616 = arith.select %613, %615, %611 : vector<4x128xi1>, vector<4x128xf32>
    %617 = arith.addf %596, %616 : vector<4x128xf32>
    %c14_i32 = arith.constant 14 : i32
    %618 = vector.broadcast %c14_i32 : i32 to vector<4x4xi32>
    %619 = arith.shrsi %0, %618 : vector<4x4xi32>
    %c3_i32_147 = arith.constant 3 : i32
    %620 = vector.broadcast %c3_i32_147 : i32 to vector<4x4xi32>
    %621 = arith.andi %619, %620 : vector<4x4xi32>
    %622 = vector.extract_strided_slice %621 {offsets = [0, 0], sizes = [4, 1], strides = [1, 1]} : vector<4x4xi32> to vector<4x1xi32>
    %c21 = arith.constant 21 : index
    %c0_148 = arith.constant 0 : index
    %623 = vector.load %arg2[%c21, %c0_148] : memref<108x128xf32, #tpu.memory_space<vmem>>, vector<1x128xf32>
    %c22 = arith.constant 22 : index
    %c0_149 = arith.constant 0 : index
    %624 = vector.load %arg2[%c22, %c0_149] : memref<108x128xf32, #tpu.memory_space<vmem>>, vector<1x128xf32>
    %c23 = arith.constant 23 : index
    %c0_150 = arith.constant 0 : index
    %625 = vector.load %arg2[%c23, %c0_150] : memref<108x128xf32, #tpu.memory_space<vmem>>, vector<1x128xf32>
    %c0_i32_151 = arith.constant 0 : i32
    %626 = vector.broadcast %c0_i32_151 : i32 to vector<4x1xi32>
    %627 = arith.cmpi eq, %622, %626 : vector<4x1xi32>
    %c1_i32_152 = arith.constant 1 : i32
    %628 = vector.broadcast %c1_i32_152 : i32 to vector<4x1xi32>
    %629 = arith.cmpi eq, %622, %628 : vector<4x1xi32>
    %630 = vector.shape_cast %629 : vector<4x1xi1> to vector<4x1xi1>
    %631 = vector.broadcast %630 : vector<4x1xi1> to vector<4x128xi1>
    %632 = vector.shape_cast %624 : vector<1x128xf32> to vector<1x128xf32>
    %633 = vector.broadcast %632 : vector<1x128xf32> to vector<4x128xf32>
    %634 = vector.shape_cast %625 : vector<1x128xf32> to vector<1x128xf32>
    %635 = vector.broadcast %634 : vector<1x128xf32> to vector<4x128xf32>
    %636 = arith.select %631, %633, %635 : vector<4x128xi1>, vector<4x128xf32>
    %637 = vector.shape_cast %627 : vector<4x1xi1> to vector<4x1xi1>
    %638 = vector.broadcast %637 : vector<4x1xi1> to vector<4x128xi1>
    %639 = vector.shape_cast %623 : vector<1x128xf32> to vector<1x128xf32>
    %640 = vector.broadcast %639 : vector<1x128xf32> to vector<4x128xf32>
    %641 = arith.select %638, %640, %636 : vector<4x128xi1>, vector<4x128xf32>
    %642 = arith.addf %617, %641 : vector<4x128xf32>
    %643 = vector.extract_strided_slice %621 {offsets = [0, 1], sizes = [4, 1], strides = [1, 1]} : vector<4x4xi32> to vector<4x1xi32>
    %c48 = arith.constant 48 : index
    %c0_153 = arith.constant 0 : index
    %644 = vector.load %arg2[%c48, %c0_153] : memref<108x128xf32, #tpu.memory_space<vmem>>, vector<1x128xf32>
    %c49 = arith.constant 49 : index
    %c0_154 = arith.constant 0 : index
    %645 = vector.load %arg2[%c49, %c0_154] : memref<108x128xf32, #tpu.memory_space<vmem>>, vector<1x128xf32>
    %c50 = arith.constant 50 : index
    %c0_155 = arith.constant 0 : index
    %646 = vector.load %arg2[%c50, %c0_155] : memref<108x128xf32, #tpu.memory_space<vmem>>, vector<1x128xf32>
    %c0_i32_156 = arith.constant 0 : i32
    %647 = vector.broadcast %c0_i32_156 : i32 to vector<4x1xi32>
    %648 = arith.cmpi eq, %643, %647 : vector<4x1xi32>
    %c1_i32_157 = arith.constant 1 : i32
    %649 = vector.broadcast %c1_i32_157 : i32 to vector<4x1xi32>
    %650 = arith.cmpi eq, %643, %649 : vector<4x1xi32>
    %651 = vector.shape_cast %650 : vector<4x1xi1> to vector<4x1xi1>
    %652 = vector.broadcast %651 : vector<4x1xi1> to vector<4x128xi1>
    %653 = vector.shape_cast %645 : vector<1x128xf32> to vector<1x128xf32>
    %654 = vector.broadcast %653 : vector<1x128xf32> to vector<4x128xf32>
    %655 = vector.shape_cast %646 : vector<1x128xf32> to vector<1x128xf32>
    %656 = vector.broadcast %655 : vector<1x128xf32> to vector<4x128xf32>
    %657 = arith.select %652, %654, %656 : vector<4x128xi1>, vector<4x128xf32>
    %658 = vector.shape_cast %648 : vector<4x1xi1> to vector<4x1xi1>
    %659 = vector.broadcast %658 : vector<4x1xi1> to vector<4x128xi1>
    %660 = vector.shape_cast %644 : vector<1x128xf32> to vector<1x128xf32>
    %661 = vector.broadcast %660 : vector<1x128xf32> to vector<4x128xf32>
    %662 = arith.select %659, %661, %657 : vector<4x128xi1>, vector<4x128xf32>
    %663 = arith.addf %642, %662 : vector<4x128xf32>
    %664 = vector.extract_strided_slice %621 {offsets = [0, 2], sizes = [4, 1], strides = [1, 1]} : vector<4x4xi32> to vector<4x1xi32>
    %c75 = arith.constant 75 : index
    %c0_158 = arith.constant 0 : index
    %665 = vector.load %arg2[%c75, %c0_158] : memref<108x128xf32, #tpu.memory_space<vmem>>, vector<1x128xf32>
    %c76 = arith.constant 76 : index
    %c0_159 = arith.constant 0 : index
    %666 = vector.load %arg2[%c76, %c0_159] : memref<108x128xf32, #tpu.memory_space<vmem>>, vector<1x128xf32>
    %c77 = arith.constant 77 : index
    %c0_160 = arith.constant 0 : index
    %667 = vector.load %arg2[%c77, %c0_160] : memref<108x128xf32, #tpu.memory_space<vmem>>, vector<1x128xf32>
    %c0_i32_161 = arith.constant 0 : i32
    %668 = vector.broadcast %c0_i32_161 : i32 to vector<4x1xi32>
    %669 = arith.cmpi eq, %664, %668 : vector<4x1xi32>
    %c1_i32_162 = arith.constant 1 : i32
    %670 = vector.broadcast %c1_i32_162 : i32 to vector<4x1xi32>
    %671 = arith.cmpi eq, %664, %670 : vector<4x1xi32>
    %672 = vector.shape_cast %671 : vector<4x1xi1> to vector<4x1xi1>
    %673 = vector.broadcast %672 : vector<4x1xi1> to vector<4x128xi1>
    %674 = vector.shape_cast %666 : vector<1x128xf32> to vector<1x128xf32>
    %675 = vector.broadcast %674 : vector<1x128xf32> to vector<4x128xf32>
    %676 = vector.shape_cast %667 : vector<1x128xf32> to vector<1x128xf32>
    %677 = vector.broadcast %676 : vector<1x128xf32> to vector<4x128xf32>
    %678 = arith.select %673, %675, %677 : vector<4x128xi1>, vector<4x128xf32>
    %679 = vector.shape_cast %669 : vector<4x1xi1> to vector<4x1xi1>
    %680 = vector.broadcast %679 : vector<4x1xi1> to vector<4x128xi1>
    %681 = vector.shape_cast %665 : vector<1x128xf32> to vector<1x128xf32>
    %682 = vector.broadcast %681 : vector<1x128xf32> to vector<4x128xf32>
    %683 = arith.select %680, %682, %678 : vector<4x128xi1>, vector<4x128xf32>
    %684 = arith.addf %663, %683 : vector<4x128xf32>
    %685 = vector.extract_strided_slice %621 {offsets = [0, 3], sizes = [4, 1], strides = [1, 1]} : vector<4x4xi32> to vector<4x1xi32>
    %c102 = arith.constant 102 : index
    %c0_163 = arith.constant 0 : index
    %686 = vector.load %arg2[%c102, %c0_163] : memref<108x128xf32, #tpu.memory_space<vmem>>, vector<1x128xf32>
    %c103 = arith.constant 103 : index
    %c0_164 = arith.constant 0 : index
    %687 = vector.load %arg2[%c103, %c0_164] : memref<108x128xf32, #tpu.memory_space<vmem>>, vector<1x128xf32>
    %c104 = arith.constant 104 : index
    %c0_165 = arith.constant 0 : index
    %688 = vector.load %arg2[%c104, %c0_165] : memref<108x128xf32, #tpu.memory_space<vmem>>, vector<1x128xf32>
    %c0_i32_166 = arith.constant 0 : i32
    %689 = vector.broadcast %c0_i32_166 : i32 to vector<4x1xi32>
    %690 = arith.cmpi eq, %685, %689 : vector<4x1xi32>
    %c1_i32_167 = arith.constant 1 : i32
    %691 = vector.broadcast %c1_i32_167 : i32 to vector<4x1xi32>
    %692 = arith.cmpi eq, %685, %691 : vector<4x1xi32>
    %693 = vector.shape_cast %692 : vector<4x1xi1> to vector<4x1xi1>
    %694 = vector.broadcast %693 : vector<4x1xi1> to vector<4x128xi1>
    %695 = vector.shape_cast %687 : vector<1x128xf32> to vector<1x128xf32>
    %696 = vector.broadcast %695 : vector<1x128xf32> to vector<4x128xf32>
    %697 = vector.shape_cast %688 : vector<1x128xf32> to vector<1x128xf32>
    %698 = vector.broadcast %697 : vector<1x128xf32> to vector<4x128xf32>
    %699 = arith.select %694, %696, %698 : vector<4x128xi1>, vector<4x128xf32>
    %700 = vector.shape_cast %690 : vector<4x1xi1> to vector<4x1xi1>
    %701 = vector.broadcast %700 : vector<4x1xi1> to vector<4x128xi1>
    %702 = vector.shape_cast %686 : vector<1x128xf32> to vector<1x128xf32>
    %703 = vector.broadcast %702 : vector<1x128xf32> to vector<4x128xf32>
    %704 = arith.select %701, %703, %699 : vector<4x128xi1>, vector<4x128xf32>
    %705 = arith.addf %684, %704 : vector<4x128xf32>
    %c16_i32 = arith.constant 16 : i32
    %706 = vector.broadcast %c16_i32 : i32 to vector<4x4xi32>
    %707 = arith.shrsi %0, %706 : vector<4x4xi32>
    %c3_i32_168 = arith.constant 3 : i32
    %708 = vector.broadcast %c3_i32_168 : i32 to vector<4x4xi32>
    %709 = arith.andi %707, %708 : vector<4x4xi32>
    %710 = vector.extract_strided_slice %709 {offsets = [0, 0], sizes = [4, 1], strides = [1, 1]} : vector<4x4xi32> to vector<4x1xi32>
    %c24 = arith.constant 24 : index
    %c0_169 = arith.constant 0 : index
    %711 = vector.load %arg2[%c24, %c0_169] : memref<108x128xf32, #tpu.memory_space<vmem>>, vector<1x128xf32>
    %c25 = arith.constant 25 : index
    %c0_170 = arith.constant 0 : index
    %712 = vector.load %arg2[%c25, %c0_170] : memref<108x128xf32, #tpu.memory_space<vmem>>, vector<1x128xf32>
    %c26 = arith.constant 26 : index
    %c0_171 = arith.constant 0 : index
    %713 = vector.load %arg2[%c26, %c0_171] : memref<108x128xf32, #tpu.memory_space<vmem>>, vector<1x128xf32>
    %c0_i32_172 = arith.constant 0 : i32
    %714 = vector.broadcast %c0_i32_172 : i32 to vector<4x1xi32>
    %715 = arith.cmpi eq, %710, %714 : vector<4x1xi32>
    %c1_i32_173 = arith.constant 1 : i32
    %716 = vector.broadcast %c1_i32_173 : i32 to vector<4x1xi32>
    %717 = arith.cmpi eq, %710, %716 : vector<4x1xi32>
    %718 = vector.shape_cast %717 : vector<4x1xi1> to vector<4x1xi1>
    %719 = vector.broadcast %718 : vector<4x1xi1> to vector<4x128xi1>
    %720 = vector.shape_cast %712 : vector<1x128xf32> to vector<1x128xf32>
    %721 = vector.broadcast %720 : vector<1x128xf32> to vector<4x128xf32>
    %722 = vector.shape_cast %713 : vector<1x128xf32> to vector<1x128xf32>
    %723 = vector.broadcast %722 : vector<1x128xf32> to vector<4x128xf32>
    %724 = arith.select %719, %721, %723 : vector<4x128xi1>, vector<4x128xf32>
    %725 = vector.shape_cast %715 : vector<4x1xi1> to vector<4x1xi1>
    %726 = vector.broadcast %725 : vector<4x1xi1> to vector<4x128xi1>
    %727 = vector.shape_cast %711 : vector<1x128xf32> to vector<1x128xf32>
    %728 = vector.broadcast %727 : vector<1x128xf32> to vector<4x128xf32>
    %729 = arith.select %726, %728, %724 : vector<4x128xi1>, vector<4x128xf32>
    %730 = arith.addf %705, %729 : vector<4x128xf32>
    %731 = vector.extract_strided_slice %709 {offsets = [0, 1], sizes = [4, 1], strides = [1, 1]} : vector<4x4xi32> to vector<4x1xi32>
    %c51 = arith.constant 51 : index
    %c0_174 = arith.constant 0 : index
    %732 = vector.load %arg2[%c51, %c0_174] : memref<108x128xf32, #tpu.memory_space<vmem>>, vector<1x128xf32>
    %c52 = arith.constant 52 : index
    %c0_175 = arith.constant 0 : index
    %733 = vector.load %arg2[%c52, %c0_175] : memref<108x128xf32, #tpu.memory_space<vmem>>, vector<1x128xf32>
    %c53 = arith.constant 53 : index
    %c0_176 = arith.constant 0 : index
    %734 = vector.load %arg2[%c53, %c0_176] : memref<108x128xf32, #tpu.memory_space<vmem>>, vector<1x128xf32>
    %c0_i32_177 = arith.constant 0 : i32
    %735 = vector.broadcast %c0_i32_177 : i32 to vector<4x1xi32>
    %736 = arith.cmpi eq, %731, %735 : vector<4x1xi32>
    %c1_i32_178 = arith.constant 1 : i32
    %737 = vector.broadcast %c1_i32_178 : i32 to vector<4x1xi32>
    %738 = arith.cmpi eq, %731, %737 : vector<4x1xi32>
    %739 = vector.shape_cast %738 : vector<4x1xi1> to vector<4x1xi1>
    %740 = vector.broadcast %739 : vector<4x1xi1> to vector<4x128xi1>
    %741 = vector.shape_cast %733 : vector<1x128xf32> to vector<1x128xf32>
    %742 = vector.broadcast %741 : vector<1x128xf32> to vector<4x128xf32>
    %743 = vector.shape_cast %734 : vector<1x128xf32> to vector<1x128xf32>
    %744 = vector.broadcast %743 : vector<1x128xf32> to vector<4x128xf32>
    %745 = arith.select %740, %742, %744 : vector<4x128xi1>, vector<4x128xf32>
    %746 = vector.shape_cast %736 : vector<4x1xi1> to vector<4x1xi1>
    %747 = vector.broadcast %746 : vector<4x1xi1> to vector<4x128xi1>
    %748 = vector.shape_cast %732 : vector<1x128xf32> to vector<1x128xf32>
    %749 = vector.broadcast %748 : vector<1x128xf32> to vector<4x128xf32>
    %750 = arith.select %747, %749, %745 : vector<4x128xi1>, vector<4x128xf32>
    %751 = arith.addf %730, %750 : vector<4x128xf32>
    %752 = vector.extract_strided_slice %709 {offsets = [0, 2], sizes = [4, 1], strides = [1, 1]} : vector<4x4xi32> to vector<4x1xi32>
    %c78 = arith.constant 78 : index
    %c0_179 = arith.constant 0 : index
    %753 = vector.load %arg2[%c78, %c0_179] : memref<108x128xf32, #tpu.memory_space<vmem>>, vector<1x128xf32>
    %c79 = arith.constant 79 : index
    %c0_180 = arith.constant 0 : index
    %754 = vector.load %arg2[%c79, %c0_180] : memref<108x128xf32, #tpu.memory_space<vmem>>, vector<1x128xf32>
    %c80 = arith.constant 80 : index
    %c0_181 = arith.constant 0 : index
    %755 = vector.load %arg2[%c80, %c0_181] : memref<108x128xf32, #tpu.memory_space<vmem>>, vector<1x128xf32>
    %c0_i32_182 = arith.constant 0 : i32
    %756 = vector.broadcast %c0_i32_182 : i32 to vector<4x1xi32>
    %757 = arith.cmpi eq, %752, %756 : vector<4x1xi32>
    %c1_i32_183 = arith.constant 1 : i32
    %758 = vector.broadcast %c1_i32_183 : i32 to vector<4x1xi32>
    %759 = arith.cmpi eq, %752, %758 : vector<4x1xi32>
    %760 = vector.shape_cast %759 : vector<4x1xi1> to vector<4x1xi1>
    %761 = vector.broadcast %760 : vector<4x1xi1> to vector<4x128xi1>
    %762 = vector.shape_cast %754 : vector<1x128xf32> to vector<1x128xf32>
    %763 = vector.broadcast %762 : vector<1x128xf32> to vector<4x128xf32>
    %764 = vector.shape_cast %755 : vector<1x128xf32> to vector<1x128xf32>
    %765 = vector.broadcast %764 : vector<1x128xf32> to vector<4x128xf32>
    %766 = arith.select %761, %763, %765 : vector<4x128xi1>, vector<4x128xf32>
    %767 = vector.shape_cast %757 : vector<4x1xi1> to vector<4x1xi1>
    %768 = vector.broadcast %767 : vector<4x1xi1> to vector<4x128xi1>
    %769 = vector.shape_cast %753 : vector<1x128xf32> to vector<1x128xf32>
    %770 = vector.broadcast %769 : vector<1x128xf32> to vector<4x128xf32>
    %771 = arith.select %768, %770, %766 : vector<4x128xi1>, vector<4x128xf32>
    %772 = arith.addf %751, %771 : vector<4x128xf32>
    %773 = vector.extract_strided_slice %709 {offsets = [0, 3], sizes = [4, 1], strides = [1, 1]} : vector<4x4xi32> to vector<4x1xi32>
    %c105 = arith.constant 105 : index
    %c0_184 = arith.constant 0 : index
    %774 = vector.load %arg2[%c105, %c0_184] : memref<108x128xf32, #tpu.memory_space<vmem>>, vector<1x128xf32>
    %c106 = arith.constant 106 : index
    %c0_185 = arith.constant 0 : index
    %775 = vector.load %arg2[%c106, %c0_185] : memref<108x128xf32, #tpu.memory_space<vmem>>, vector<1x128xf32>
    %c107 = arith.constant 107 : index
    %c0_186 = arith.constant 0 : index
    %776 = vector.load %arg2[%c107, %c0_186] : memref<108x128xf32, #tpu.memory_space<vmem>>, vector<1x128xf32>
    %c0_i32_187 = arith.constant 0 : i32
    %777 = vector.broadcast %c0_i32_187 : i32 to vector<4x1xi32>
    %778 = arith.cmpi eq, %773, %777 : vector<4x1xi32>
    %c1_i32_188 = arith.constant 1 : i32
    %779 = vector.broadcast %c1_i32_188 : i32 to vector<4x1xi32>
    %780 = arith.cmpi eq, %773, %779 : vector<4x1xi32>
    %781 = vector.shape_cast %780 : vector<4x1xi1> to vector<4x1xi1>
    %782 = vector.broadcast %781 : vector<4x1xi1> to vector<4x128xi1>
    %783 = vector.shape_cast %775 : vector<1x128xf32> to vector<1x128xf32>
    %784 = vector.broadcast %783 : vector<1x128xf32> to vector<4x128xf32>
    %785 = vector.shape_cast %776 : vector<1x128xf32> to vector<1x128xf32>
    %786 = vector.broadcast %785 : vector<1x128xf32> to vector<4x128xf32>
    %787 = arith.select %782, %784, %786 : vector<4x128xi1>, vector<4x128xf32>
    %788 = vector.shape_cast %778 : vector<4x1xi1> to vector<4x1xi1>
    %789 = vector.broadcast %788 : vector<4x1xi1> to vector<4x128xi1>
    %790 = vector.shape_cast %774 : vector<1x128xf32> to vector<1x128xf32>
    %791 = vector.broadcast %790 : vector<1x128xf32> to vector<4x128xf32>
    %792 = arith.select %789, %791, %787 : vector<4x128xi1>, vector<4x128xf32>
    %793 = arith.addf %772, %792 : vector<4x128xf32>
    %c0_189 = arith.constant 0 : index
    %c0_190 = arith.constant 0 : index
    %794 = vector.load %arg3[%c0_189, %c0_190] : memref<4x128xf32, #tpu.memory_space<vmem>>, vector<4x128xf32>
    tpu.vector_store %arg3[%c0_189, %c0_190], %793 {strides = array<i32>} : memref<4x128xf32, #tpu.memory_space<vmem>>, vector<4x128xf32>,
    return
  }
  func.func @transform_0(%arg0: i32) -> (i32, i32) {
    %c0_i32 = arith.constant 0 : i32
    %c0_i32_0 = arith.constant 0 : i32
    return %arg0, %c0_i32 : i32, i32
  }
  func.func @transform_1(%arg0: i32) -> (i32, i32) {
    %c0_i32 = arith.constant 0 : i32
    %c0_i32_0 = arith.constant 0 : i32
    %c0_i32_1 = arith.constant 0 : i32
    return %c0_i32, %c0_i32_0 : i32, i32
  }
  func.func @transform_2(%arg0: i32) -> (i32, i32) {
    %c0_i32 = arith.constant 0 : i32
    %c0_i32_0 = arith.constant 0 : i32
    return %arg0, %c0_i32 : i32, i32
  }
}

</mosaic_0001>

<bundles_post_ra>
// kernel: multi_tech_encoder.1
= control target key start
LH: loop header
LB: loop body
LE: loop exit
PB: predicated region body
PF: predicated region fallthrough
CT: control target
= control target key end

     0   :  { %7 = vsyncpa [#allocation3], 0  ;;  %s1201_s9 = smov [#allocation2]   ;;  %s1445_s0 = inlined_call_operand.vmem [shape: s32[4,4], index: 0, kind: input, shape index: {}]   ;;  %s1446_s1 = inlined_call_operand.hbm [shape: f32[108,128], index: 1, kind: input, shape index: {}]   ;;  %s1447_s2 = inlined_call_operand.vmem [shape: f32[4,128], index: 2, kind: output, shape index: {}]  }
   0x1   :  { %s15_s10 = sshll.u32 %s1201_s9, 4  ;;  %s16_s10 = int_to_ptr.vmem [resolvable:$true] %s15_s10 }
   0x2   :  { %s1187_s11 = scalar_lea.vmem %s16_s10, 1792  ;;  %p1192_p1 = scmp.lt.s32.totalorder %s16_s10, %s16_s10 }
   0x3   :  { %p1188_p0 = scmp.ne.s32.totalorder %s16_s10, %s1187_s11  ;;  %p1193_p2 = scmp.lt.s32.totalorder %s1187_s11, %s1187_s11 }
   0x5   :  { %p1194_p3 = por %p1193_p2, %p1192_p1 }
   0x7   :  { %p1195_p4 = pnand %p1194_p3, %p1188_p0 }
   0x9   :  { %1198 = shalt.err (!%p1195_p4)
}
   0xa   :  { %s1202_s12 = smov 128   ;;  %s1203_s13 = smov 8  }
   0xb   :  { %21 = dma.hbm_to_vmem [thread:$0]  %s1446_s1, 1792, %s16_s10, [#allocation3], %s1202_s12, %s1202_s12, %s1203_s13  }
   0xc   :  { %1199 = dma.done.wait [#allocation3], 1792  }
   0xd   :  { %1200 = vsyncadd [#allocation3], 4294965504  ;;  %v1204_v0 = vmov 2   ;;  %v1205_v1 = vmov 1   ;;  %v1231_v2 = vld [vmem:[%s1445_s0] sm:$0xf] }
   0xe   :  { %1137 = vset.pattern.permute.xlu0 %v1204_v0  ;;  %1136 = vset.pattern.permute.xlu1 %v1205_v1  ;;  %v26_v3 = vand.u32 3, %v1231_v2  ;;  %v135_v4 = vshra.s32 %v1231_v2, 2  ;;  %v1206_v6 = vmov 0   ;;  %v245_v10 = vshra.s32 %v1231_v2, 4  ;;  %v1024_v42 = vld [vmem:[#allocation2 + $0x1c] ss:$0 sm:$0xff] }
   0xf   :  { %v355_v12 = vshra.s32 %v1231_v2, 6  ;;  %v575_v14 = vshra.s32 %v1231_v2, 10  ;;  %v1207_v15 = vmov 3   ;;  %v465_v21 = vshra.s32 %v1231_v2, 8  ;;  %v1025_v43 = vld [vmem:[#allocation2 + $0x1d] ss:$0 sm:$0xff] }
  0x10   :  { %vm31_vm0 = vcmp.eq.s32.totalorder %v26_v3, 1  ;;  %v136_v5 = vand.u32 3, %v135_v4  ;;  %vm30_vm1 = vcmp.eq.s32.totalorder %v26_v3, 0  ;;  %v246_v11 = vand.u32 3, %v245_v10  ;;  %v1026_v44 = vld [vmem:[#allocation2 + $0x1b] ss:$0 sm:$0xff] }
  0x11   :  { %v32_v7 = vsel %vm31_vm0, 1, %v1206_v6  ;;  %v46_v9 = vsel %vm30_vm1, 1, %v1206_v6  ;;  %v356_v13 = vand.u32 3, %v355_v12  ;;  %v576_v17 = vand.u32 3, %v575_v14  ;;  %v1021_v49 = vld [vmem:[#allocation2 + $0x1] ss:$0 sm:$0xff] }
  0x12   :  { %87 = vperm.xlu0 %1137, %v32_v7   ;;  %61 = vperm.xlu1 %1136, %v32_v7   ;;  %vm140_vm2 = vcmp.eq.s32.totalorder %v136_v5, 0  ;;  %vm251_vm3 = vcmp.eq.s32.totalorder %v246_v11, 1  ;;  %vm141_vm4 = vcmp.eq.s32.totalorder %v136_v5, 1  ;;  %vm250_vm7 = vcmp.eq.s32.totalorder %v246_v11, 0  ;;  %v1022_v50 = vld [vmem:[#allocation2 + $0x2] ss:$0 sm:$0xff] }
  0x13   :  { %v156_v8 = vsel %vm140_vm2, 1, %v1206_v6  ;;  %v252_v16 = vsel %vm251_vm3, 1, %v1206_v6  ;;  %vm360_vm5 = vcmp.eq.s32.totalorder %v356_v13, 0  ;;  %v142_v18 = vsel %vm141_vm4, 1, %v1206_v6  ;;  %v1027_v53 = vld [vmem:[#allocation2 + $0x37] ss:$0 sm:$0xff] }
  0x14   :  { %v1248_v19 = vsel %vm360_vm5, 1, %v1206_v6  ;;  %vm581_vm6 = vcmp.eq.s32.totalorder %v576_v17, 1  ;;  %v466_v22 = vand.u32 3, %v465_v21  ;;  %v266_v23 = vsel %vm250_vm7, 1, %v1206_v6  ;;  %v1028_v54 = vld [vmem:[#allocation2 + $0x38] ss:$0 sm:$0xff] }
  0x15   :  { %v1252_v20 = vsel %vm581_vm6, 1, %v1206_v6  ;;  %vm580_vm9 = vcmp.eq.s32.totalorder %v576_v17, 0  ;;  %v685_v26 = vshra.s32 %v1231_v2, 12  ;;  %vm361_vm11 = vcmp.eq.s32.totalorder %v356_v13, 1  ;;  %v1023_v56 = vld [vmem:[#allocation2] ss:$0 sm:$0xff] }
  0x16   :  { %210 = vperm.xlu0 %1137, %v156_v8   ;;  %74 = vperm.xlu1 %1136, %v46_v9   ;;  %vm471_vm8 = vcmp.eq.s32.totalorder %v466_v22, 1  ;;  %v1266_v25 = vsel %vm580_vm9, 1, %v1206_v6  ;;  %v795_v29 = vshra.s32 %v1231_v2, 14  ;;  %v362_v30 = vsel %vm361_vm11, 1, %v1206_v6  ;;  %v1029_v59 = vld [vmem:[#allocation2 + $0x36] ss:$0 sm:$0xff] }
  0x17   :  { %v1261_v24 = vsel %vm471_vm8, 1, %v1206_v6  ;;  %v686_v27 = vand.u32 3, %v685_v26  ;;  %vm470_vm12 = vcmp.eq.s32.totalorder %v466_v22, 0  ;;  %v905_v34 = vshra.s32 %v1231_v2, 16  ;;  %v1033_v5 = vld [vmem:[#allocation2 + $0x4] ss:$0 sm:$0xff] }
  0x18   :  { %v796_v31 = vand.u32 3, %v795_v29  ;;  %v486_v32 = vsel %vm470_vm12, 1, %v1206_v6  ;;  %v1042_v21 = vld [vmem:[#allocation2 + $0x55] ss:$0 sm:$0xff]  ;;  %v1043_v22 = vld [vmem:[#allocation2 + $0x56] ss:$0 sm:$0xff] }
  0x19   :  { %vm690_vm10 = vcmp.eq.s32.totalorder %v686_v27, 0  ;;  %vm691_vm13 = vcmp.eq.s32.totalorder %v686_v27, 1  ;;  %v906_v36 = vand.u32 3, %v905_v34  ;;  %v1030_v29 = vld [vmem:[#allocation2 + $0x52] ss:$0 sm:$0xff] }
  0x1a   :  { %1143 = vset.pattern.permute.xlu0 %v1206_v6  ;;  %1138 = vset.pattern.permute.xlu1 %v1204_v0  ;;  %v1277_v28 = vsel %vm690_vm10, 1, %v1206_v6  ;;  %v1287_v33 = vsel %vm691_vm13, 1, %v1206_v6  ;;  %vm800_vm14 = vcmp.eq.s32.totalorder %v796_v31, 0  ;;  %vm801_vm0 = vcmp.eq.s32.totalorder %v796_v31, 1  ;;  %v1036_v31 = vld [vmem:[#allocation2 + $0x1f] ss:$0 sm:$0xff] }
  0x1b   :  { %34 = vperm.xlu0 %1143, %v32_v7   ;;  %100 = vperm.xlu1 %1138, %v46_v9   ;;  %v1293_v35 = vsel %vm800_vm14, 1, %v1206_v6  ;;  %vm911_vm15 = vcmp.eq.s32.totalorder %v906_v36, 1  ;;  %v1307_v38 = vsel %vm801_vm0, 1, %v1206_v6  ;;  %vm910_vm1 = vcmp.eq.s32.totalorder %v906_v36, 0 }
  0x1c   :  { %v1302_v37 = vsel %vm911_vm15, 1, %v1206_v6  ;;  %v1314_v39 = vsel %vm910_vm1, 1, %v1206_v6 }
  0x1f   :  { %48 = vperm.xlu0 %1143, %v46_v9   ;;  %1139 = vset.pattern.permute.xlu1 %v1207_v15 }
  0x20   :  { %113 = vperm.xlu1 %1139, %v32_v7   ;;  %v1034_v7 = vld [vmem:[#allocation2 + $0x5] ss:$0 sm:$0xff] }
  0x23   :  { %254 = vperm.xlu0 %1143, %v252_v16  }
  0x24   :  { %1140 = vset.pattern.permute.xlu1 %v1206_v6 }
  0x25   :  { %144 = vperm.xlu1 %1140, %v142_v18  }
  0x27   :  { %378 = vperm.xlu0 %1143, %v1248_v19  }
  0x29   :  { %158 = vperm.xlu1 %1140, %v156_v8  }
  0x2b   :  { %584 = vperm.xlu0 %1143, %v1252_v20  }
  0x2d   :  { %1141 = vset.pattern.permute.xlu1 %v1205_v1 }
  0x2e   :  { %184 = vperm.xlu1 %1141, %v156_v8  }
  0x2f   :  { %1157 = vset.pattern.permute.xlu0 %v1205_v1 }
  0x30   :  { %171 = vperm.xlu0 %1157, %v142_v18  }
  0x32   :  { %1142 = vset.pattern.permute.xlu1 %v1204_v0 }
  0x33   :  { %197 = vperm.xlu1 %1142, %v142_v18  }
  0x34   :  { %294 = vperm.xlu0 %1157, %v266_v23  }
  0x37   :  { %1144 = vset.pattern.permute.xlu1 %v1207_v15 }
  0x38   :  { %501 = vperm.xlu0 %1157, %v1261_v24   ;;  %223 = vperm.xlu1 %1144, %v142_v18  }
  0x3c   :  { %624 = vperm.xlu0 %1157, %v1266_v25   ;;  %236 = vperm.xlu1 %1144, %v156_v8  }
  0x40   :  { %1160 = vset.pattern.permute.xlu0 %v1207_v15  ;;  %1145 = vset.pattern.permute.xlu1 %v1206_v6 }
  0x41   :  { %126 = vperm.xlu0 %1160, %v46_v9   ;;  %268 = vperm.xlu1 %1145, %v266_v23   ;;  %v1035_v9 = vld [vmem:[#allocation2 + $0x3] ss:$0 sm:$0xff] }
  0x45   :  { %1146 = vset.pattern.permute.xlu1 %v1205_v1  ;;  %333 = vperm.xlu0 %1160, %v252_v16  }
  0x46   :  { %281 = vperm.xlu1 %1146, %v252_v16  }
  0x49   :  { %456 = vperm.xlu0 %1160, %v1248_v19  }
  0x4a   :  { %1147 = vset.pattern.permute.xlu1 %v1204_v0 }
  0x4b   :  { %307 = vperm.xlu1 %1147, %v252_v16  }
  0x4d   :  { %663 = vperm.xlu0 %1160, %v1252_v20  }
  0x4f   :  { %320 = vperm.xlu1 %1147, %v266_v23  }
  0x51   :  { %786 = vperm.xlu0 %1160, %v1277_v28  }
  0x53   :  { %1148 = vset.pattern.permute.xlu1 %v1207_v15 }
  0x54   :  { %346 = vperm.xlu1 %1148, %v266_v23   ;;  %v1044_v23 = vld [vmem:[#allocation2 + $0x54] ss:$0 sm:$0xff] }
  0x55   :  { %1167 = vset.pattern.permute.xlu0 %v1204_v0 }
  0x56   :  { %417 = vperm.xlu0 %1167, %v362_v30  }
  0x58   :  { %1149 = vset.pattern.permute.xlu1 %v1206_v6 }
  0x59   :  { %364 = vperm.xlu1 %1149, %v362_v30  }
  0x5a   :  { %540 = vperm.xlu0 %1167, %v486_v32  }
  0x5d   :  { %1150 = vset.pattern.permute.xlu1 %v1205_v1 }
  0x5e   :  { %391 = vperm.xlu1 %1150, %v362_v30   ;;  %747 = vperm.xlu0 %1167, %v1287_v33  }
  0x62   :  { %404 = vperm.xlu1 %1150, %v1248_v19   ;;  %870 = vperm.xlu0 %1167, %v1293_v35  }
  0x66   :  { %1151 = vset.pattern.permute.xlu1 %v1204_v0  ;;  %1171 = vset.pattern.permute.xlu0 %v1206_v6 }
  0x67   :  { %430 = vperm.xlu1 %1151, %v1248_v19   ;;  %708 = vperm.xlu0 %1171, %v1277_v28  }
  0x6b   :  { %1152 = vset.pattern.permute.xlu1 %v1207_v15  ;;  %914 = vperm.xlu0 %1171, %v1302_v37  }
  0x6c   :  { %443 = vperm.xlu1 %1152, %v362_v30   ;;  %v1031_v30 = vld [vmem:[#allocation2 + $0x53] ss:$0 sm:$0xff] }
  0x6f   :  { %1173 = vset.pattern.permute.xlu0 %v1205_v1 }
  0x70   :  { %1153 = vset.pattern.permute.xlu1 %v1206_v6  ;;  %831 = vperm.xlu0 %1173, %v1307_v38  }
  0x71   :  { %474 = vperm.xlu1 %1153, %v1261_v24  }
  0x74   :  { %954 = vperm.xlu0 %1173, %v1314_v39  }
  0x75   :  { %488 = vperm.xlu1 %1153, %v486_v32  }
  0x78   :  { %1177 = vset.pattern.permute.xlu0 %v1207_v15 }
  0x79   :  { %1154 = vset.pattern.permute.xlu1 %v1205_v1  ;;  %993 = vperm.xlu0 %1177, %v1302_v37  }
  0x7a   :  { %514 = vperm.xlu1 %1154, %v486_v32  }
  0x7e   :  { %1155 = vset.pattern.permute.xlu1 %v1204_v0 }
  0x7f   :  { %527 = vperm.xlu1 %1155, %v1261_v24  }
  0x83   :  { %1156 = vset.pattern.permute.xlu1 %v1207_v15 }
  0x84   :  { %553 = vperm.xlu1 %1156, %v1261_v24  }
  0x88   :  { %566 = vperm.xlu1 %1156, %v486_v32   ;;  %v1037_v32 = vld [vmem:[#allocation2 + $0x20] ss:$0 sm:$0xff] }
  0x8c   :  { %1158 = vset.pattern.permute.xlu1 %v1206_v6 }
  0x8d   :  { %v62_v40 = vpop.permute.xlu1 %61  ;;  %598 = vperm.xlu1 %1158, %v1266_v25   ;;  %v88_v41 = vpop.permute.xlu0 %87 }
  0x8e   :  { %vm63_vm2 = vcmp.eq.s32.totalorder %v62_v40, 1  ;;  %vm89_vm5 = vcmp.eq.s32.totalorder %v88_v41, 1  ;;  %v1039_v41 = vld [vmem:[#allocation2 + $0x3a] ss:$0 sm:$0xff] }
  0x8f   :  { %v72_v47 = vsel %vm63_vm2, %v1024_v42, %v1025_v43  ;;  %v98_v58 = vsel %vm89_vm5, %v1027_v53, %v1028_v54  ;;  %v1040_v42 = vld [vmem:[#allocation2 + $0x3b] ss:$0 sm:$0xff]  ;;  %v1038_v43 = vld [vmem:[#allocation2 + $0x1e] ss:$0 sm:$0xff] }
  0x91   :  { %1159 = vset.pattern.permute.xlu1 %v1205_v1  ;;  %v75_v45 = vpop.permute.xlu1 %74  ;;  %v1327_v46 = vpop.permute.xlu0 %210 }
  0x92   :  { %vm76_vm3 = vcmp.eq.s32.totalorder %v75_v45, 1  ;;  %611 = vperm.xlu1 %1159, %v1252_v20   ;;  %vm212_vm0 = vcmp.eq.s32.totalorder %v1327_v46, 1  ;;  %v1047_v46 = vld [vmem:[#allocation2 + $0x6] ss:$0 sm:$0xff] }
  0x93   :  { %v81_v48 = vsel %vm76_vm3, %v1026_v44, %v72_v47  ;;  %v1041_v47 = vld [vmem:[#allocation2 + $0x39] ss:$0 sm:$0xff] }
  0x96   :  { %v35_v51 = vpop.permute.xlu0 %34  ;;  %1161 = vset.pattern.permute.xlu1 %v1204_v0  ;;  %v101_v52 = vpop.permute.xlu1 %100 }
  0x97   :  { %vm36_vm4 = vcmp.eq.s32.totalorder %v35_v51, 1  ;;  %637 = vperm.xlu1 %1161, %v1252_v20   ;;  %vm102_vm6 = vcmp.eq.s32.totalorder %v101_v52, 1  ;;  %v1045_v51 = vld [vmem:[#allocation2 + $0x7] ss:$0 sm:$0xff]  ;;  %v1046_v52 = vld [vmem:[#allocation2 + $0x8] ss:$0 sm:$0xff] }
  0x98   :  { %v45_v55 = vsel %vm36_vm4, %v1021_v49, %v1022_v50  ;;  %v107_v63 = vsel %vm102_vm6, %v1029_v59, %v98_v58 }
  0x9a   :  { %v49_v57 = vpop.permute.xlu0 %48 }
  0x9b   :  { %vm50_vm7 = vcmp.eq.s32.totalorder %v49_v57, 1  ;;  %650 = vperm.xlu1 %1161, %v1266_v25   ;;  %v114_v60 = vpop.permute.xlu1 %113  ;;  %v1049_v57 = vld [vmem:[#allocation2 + $0x23] ss:$0 sm:$0xff] }
  0x9c   :  { %v55_v61 = vsel %vm50_vm7, %v1023_v56, %v45_v55  ;;  %vm115_vm12 = vcmp.eq.s32.totalorder %v114_v60, 1  ;;  %v1048_v56 = vld [vmem:[#allocation2 + $0x22] ss:$0 sm:$0xff] }
  0x9d   :  { %v82_v62 = vadd.f32 %v81_v48, %v55_v61  ;;  %v124_v40 = vsel %vm115_vm12, %v1030_v29, %v1031_v30  ;;  %v1057_v30 = vld [vmem:[#allocation2 + $0xa] ss:$0 sm:$0xff] }
  0x9e   :  { %v1333_v2 = vpop.permute.xlu0 %254 }
  0x9f   :  { %1162 = vset.pattern.permute.xlu1 %v1207_v15  ;;  %v108_v3 = vadd.f32 %v107_v63, %v82_v62  ;;  %vm256_vm2 = vcmp.eq.s32.totalorder %v1333_v2, 1  ;;  %v1050_v63 = vld [vmem:[#allocation2 + $0x21] ss:$0 sm:$0xff] }
  0xa0   :  { %676 = vperm.xlu1 %1162, %v1266_v25   ;;  %v145_v4 = vpop.permute.xlu1 %144  ;;  %v265_v58 = vsel %vm256_vm2, %v1045_v51, %v1046_v52 }
  0xa1   :  { %vm146_vm8 = vcmp.eq.s32.totalorder %v145_v4, 1  ;;  %v1051_v4 = vld [vmem:[#allocation2 + $0x3d] ss:$0 sm:$0xff] }
  0xa2   :  { %v1337_v8 = vpop.permute.xlu0 %378  ;;  %v155_v11 = vsel %vm146_vm8, %v1033_v5, %v1034_v7  ;;  %v1052_v5 = vld [vmem:[#allocation2 + $0x3e] ss:$0 sm:$0xff] }
  0xa4   :  { %1163 = vset.pattern.permute.xlu1 %v1206_v6  ;;  %v159_v10 = vpop.permute.xlu1 %158 }
  0xa5   :  { %vm160_vm9 = vcmp.eq.s32.totalorder %v159_v10, 1  ;;  %694 = vperm.xlu1 %1163, %v1287_v33  }
  0xa6   :  { %v165_v12 = vsel %vm160_vm9, %v1035_v9, %v155_v11  ;;  %v1341_v13 = vpop.permute.xlu0 %584  ;;  %v1053_v9 = vld [vmem:[#allocation2 + $0x3c] ss:$0 sm:$0xff] }
  0xa9   :  { %1164 = vset.pattern.permute.xlu1 %v1205_v1  ;;  %v185_v14 = vpop.permute.xlu1 %184 }
  0xaa   :  { %721 = vperm.xlu1 %1164, %v1287_v33   ;;  %vm186_vm1 = vcmp.eq.s32.totalorder %v185_v14, 1 }
  0xab   :  { %v172_v16 = vpop.permute.xlu0 %171 }
  0xac   :  { %vm173_vm13 = vcmp.eq.s32.totalorder %v172_v16, 1 }
  0xad   :  { %v182_v44 = vsel %vm173_vm13, %v1036_v31, %v1037_v32  ;;  %v1059_v31 = vld [vmem:[#allocation2 + $0x9] ss:$0 sm:$0xff] }
  0xae   :  { %734 = vperm.xlu1 %1164, %v1277_v28   ;;  %v198_v17 = vpop.permute.xlu1 %197  ;;  %v191_v53 = vsel %vm186_vm1, %v1038_v43, %v182_v44 }
  0xaf   :  { %v1346_v18 = vpop.permute.xlu0 %294  ;;  %vm199_vm15 = vcmp.eq.s32.totalorder %v198_v17, 1  ;;  %v1054_v17 = vld [vmem:[#allocation2 + $0x58] ss:$0 sm:$0xff] }
  0xb0   :  { %v208_v48 = vsel %vm199_vm15, %v1039_v41, %v1040_v42  ;;  %vm296_vm5 = vcmp.eq.s32.totalorder %v1346_v18, 1  ;;  %v1055_v18 = vld [vmem:[#allocation2 + $0x59] ss:$0 sm:$0xff]  ;;  %v1060_v42 = vld [vmem:[#allocation2 + $0x25] ss:$0 sm:$0xff] }
  0xb1   :  { %v217_v55 = vsel %vm212_vm0, %v1041_v47, %v208_v48  ;;  %v1064_v47 = vld [vmem:[#allocation2 + $0x41] ss:$0 sm:$0xff] }
  0xb2   :  { %1165 = vset.pattern.permute.xlu1 %v1204_v0 }
  0xb3   :  { %760 = vperm.xlu1 %1165, %v1277_v28   ;;  %v224_v19 = vpop.permute.xlu1 %223  ;;  %v1350_v20 = vpop.permute.xlu0 %501  ;;  %v1032_v28 = vld [vmem:[#allocation2 + $0x51] ss:$0 sm:$0xff] }
  0xb4   :  { %vm225_vm10 = vcmp.eq.s32.totalorder %v224_v19, 1 }
  0xb5   :  { %v234_v26 = vsel %vm225_vm10, %v1042_v21, %v1043_v22  ;;  %vm380_vm10 = vcmp.eq.s32.totalorder %v1337_v8, 1  ;;  %v1062_v8 = vld [vmem:[#allocation2 + $0x24] ss:$0 sm:$0xff] }
  0xb7   :  { %1166 = vset.pattern.permute.xlu1 %v1207_v15  ;;  %v237_v24 = vpop.permute.xlu1 %236  ;;  %v1353_v25 = vpop.permute.xlu0 %624 }
  0xb8   :  { %vm238_vm11 = vcmp.eq.s32.totalorder %v237_v24, 1  ;;  %773 = vperm.xlu1 %1166, %v1287_v33  }
  0xb9   :  { %v243_v27 = vsel %vm238_vm11, %v1044_v23, %v234_v26  ;;  %v1056_v23 = vld [vmem:[#allocation2 + $0x57] ss:$0 sm:$0xff] }
  0xbc   :  { %v127_v34 = vpop.permute.xlu0 %126  ;;  %1168 = vset.pattern.permute.xlu1 %v1206_v6  ;;  %v269_v36 = vpop.permute.xlu1 %268 }
  0xbd   :  { %vm128_vm14 = vcmp.eq.s32.totalorder %v127_v34, 1  ;;  %804 = vperm.xlu1 %1168, %v1307_v38   ;;  %vm270_vm4 = vcmp.eq.s32.totalorder %v269_v36, 1 }
  0xbe   :  { %v133_v33 = vsel %vm128_vm14, %v1032_v28, %v124_v40  ;;  %v1058_v28 = vld [vmem:[#allocation2 + $0xb] ss:$0 sm:$0xff] }
  0xbf   :  { %v134_v45 = vadd.f32 %v133_v33, %v108_v3  ;;  %v275_v3 = vsel %vm270_vm4, %v1047_v46, %v265_v58  ;;  %v1061_v33 = vld [vmem:[#allocation2 + $0x26] ss:$0 sm:$0xff]  ;;  %v1070_v46 = vld [vmem:[#allocation2 + $0xe] ss:$0 sm:$0xff]  ;;  %vm503_vm4 = vcmp.eq.s32.totalorder %v1350_v20, 1 }
  0xc0   :  { %v334_v60 = vpop.permute.xlu0 %333  ;;  %v1080_v20 = vld [vmem:[#allocation2 + $0x5d] ss:$0 sm:$0xff] }
  0xc1   :  { %v166_v49 = vadd.f32 %v165_v12, %v134_v45  ;;  %818 = vperm.xlu1 %1168, %v1293_v35   ;;  %v282_v50 = vpop.permute.xlu1 %281  ;;  %vm335_vm8 = vcmp.eq.s32.totalorder %v334_v60, 1  ;;  %v1063_v45 = vld [vmem:[#allocation2 + $0x40] ss:$0 sm:$0xff]  ;;  %v1071_v60 = vld [vmem:[#allocation2 + $0xc] ss:$0 sm:$0xff] }
  0xc2   :  { %vm283_vm3 = vcmp.eq.s32.totalorder %v282_v50, 1  ;;  %v344_v22 = vsel %vm335_vm8, %v1054_v17, %v1055_v18  ;;  %v1065_v50 = vld [vmem:[#allocation2 + $0x3f] ss:$0 sm:$0xff] }
  0xc3   :  { %v192_v54 = vadd.f32 %v191_v53, %v166_v49  ;;  %v292_v2 = vsel %vm283_vm3, %v1048_v56, %v1049_v57  ;;  %v1066_v53 = vld [vmem:[#allocation2 + $0x5b] ss:$0 sm:$0xff] }
  0xc4   :  { %v1364_v10 = vpop.permute.xlu0 %456  ;;  %v301_v11 = vsel %vm296_vm5, %v1050_v63, %v292_v2 }
  0xc5   :  { %v218_v59 = vadd.f32 %v217_v55, %v192_v54  ;;  %1169 = vset.pattern.permute.xlu1 %v1205_v1  ;;  %v1067_v54 = vld [vmem:[#allocation2 + $0x5c] ss:$0 sm:$0xff]  ;;  %vm458_vm0 = vcmp.eq.s32.totalorder %v1364_v10, 1  ;;  %v1068_v55 = vld [vmem:[#allocation2 + $0x5a] ss:$0 sm:$0xff] }
  0xc6   :  { %844 = vperm.xlu1 %1169, %v1293_v35   ;;  %v308_v61 = vpop.permute.xlu1 %307 }
  0xc7   :  { %v244_v62 = vadd.f32 %v243_v27, %v218_v59  ;;  %vm309_vm6 = vcmp.eq.s32.totalorder %v308_v61, 1 }
  0xc8   :  { %v318_v14 = vsel %vm309_vm6, %v1051_v4, %v1052_v5  ;;  %v1369_v26 = vpop.permute.xlu0 %663 }
  0xc9   :  { %v276_v7 = vadd.f32 %v275_v3, %v244_v62 }
  0xca   :  { %1170 = vset.pattern.permute.xlu1 %v1204_v0  ;;  %v321_v12 = vpop.permute.xlu1 %320 }
  0xcb   :  { %v302_v16 = vadd.f32 %v301_v11, %v276_v7  ;;  %vm322_vm7 = vcmp.eq.s32.totalorder %v321_v12, 1  ;;  %857 = vperm.xlu1 %1170, %v1307_v38  }
  0xcc   :  { %v327_v19 = vsel %vm322_vm7, %v1053_v9, %v318_v14  ;;  %v1374_v34 = vpop.permute.xlu0 %786 }
  0xcd   :  { %v328_v21 = vadd.f32 %v327_v19, %v302_v16 }
  0xcf   :  { %1172 = vset.pattern.permute.xlu1 %v1207_v15  ;;  %v347_v24 = vpop.permute.xlu1 %346 }
  0xd0   :  { %vm348_vm9 = vcmp.eq.s32.totalorder %v347_v24, 1  ;;  %883 = vperm.xlu1 %1172, %v1307_v38   ;;  %v1072_v24 = vld [vmem:[#allocation2 + $0x28] ss:$0 sm:$0xff] }
  0xd1   :  { %v353_v27 = vsel %vm348_vm9, %v1056_v23, %v344_v22  ;;  %v418_v43 = vpop.permute.xlu0 %417 }
  0xd2   :  { %v354_v29 = vadd.f32 %v353_v27, %v328_v21  ;;  %vm419_vm14 = vcmp.eq.s32.totalorder %v418_v43, 1  ;;  %v1073_v27 = vld [vmem:[#allocation2 + $0x29] ss:$0 sm:$0xff]  ;;  %v1079_v43 = vld [vmem:[#allocation2 + $0x5f] ss:$0 sm:$0xff] }
  0xd3   :  { %v428_v49 = vsel %vm419_vm14, %v1063_v45, %v1064_v47  ;;  %v1085_v45 = vld [vmem:[#allocation2 + $0x2c] ss:$0 sm:$0xff]  ;;  %vm665_vm14 = vcmp.eq.s32.totalorder %v1369_v26, 1  ;;  %v1092_v26 = vld [vmem:[#allocation2 + $0x60] ss:$0 sm:$0xff] }
  0xd4   :  { %896 = vperm.xlu1 %1172, %v1293_v35   ;;  %v365_v32 = vpop.permute.xlu1 %364 }
  0xd5   :  { %vm366_vm11 = vcmp.eq.s32.totalorder %v365_v32, 1  ;;  %v541_v19 = vpop.permute.xlu0 %540 }
  0xd6   :  { %v375_v36 = vsel %vm366_vm11, %v1057_v30, %v1058_v28  ;;  %v1076_v30 = vld [vmem:[#allocation2 + $0x44] ss:$0 sm:$0xff]  ;;  %v512_v28 = vsel %vm503_vm4, %v1072_v24, %v1073_v27  ;;  %vm542_vm7 = vcmp.eq.s32.totalorder %v541_v19, 1 }
  0xd7   :  { %v385_v40 = vsel %vm380_vm10, %v1059_v31, %v375_v36  ;;  %v1074_v31 = vld [vmem:[#allocation2 + $0x27] ss:$0 sm:$0xff]  ;;  %vm586_vm10 = vcmp.eq.s32.totalorder %v1341_v13, 1 }
  0xd8   :  { %1174 = vset.pattern.permute.xlu1 %v1206_v6  ;;  %v386_v41 = vadd.f32 %v385_v40, %v354_v29  ;;  %v1075_v29 = vld [vmem:[#allocation2 + $0x43] ss:$0 sm:$0xff]  ;;  %v1077_v40 = vld [vmem:[#allocation2 + $0x42] ss:$0 sm:$0xff] }
  0xd9   :  { %928 = vperm.xlu1 %1174, %v1314_v39   ;;  %v392_v38 = vpop.permute.xlu1 %391  ;;  %v1404_v22 = vpop.permute.xlu0 %747 }
  0xda   :  { %vm393_vm12 = vcmp.eq.s32.totalorder %v392_v38, 1  ;;  %v1081_v38 = vld [vmem:[#allocation2 + $0x10] ss:$0 sm:$0xff]  ;;  %vm749_vm4 = vcmp.eq.s32.totalorder %v1404_v22, 1  ;;  %v1101_v22 = vld [vmem:[#allocation2 + $0x48] ss:$0 sm:$0xff] }
  0xdb   :  { %v402_v44 = vsel %vm393_vm12, %v1060_v42, %v1061_v33  ;;  %v1078_v33 = vld [vmem:[#allocation2 + $0x5e] ss:$0 sm:$0xff] }
  0xdd   :  { %1175 = vset.pattern.permute.xlu1 %v1205_v1  ;;  %v405_v35 = vpop.permute.xlu1 %404 }
  0xde   :  { %vm406_vm13 = vcmp.eq.s32.totalorder %v405_v35, 1  ;;  %941 = vperm.xlu1 %1175, %v1302_v37  }
  0xdf   :  { %v411_v6 = vsel %vm406_vm13, %v1062_v8, %v402_v44  ;;  %v1082_v8 = vld [vmem:[#allocation2 + $0x11] ss:$0 sm:$0xff]  ;;  %v1084_v44 = vld [vmem:[#allocation2 + $0x2b] ss:$0 sm:$0xff]  ;;  %vm626_vm13 = vcmp.eq.s32.totalorder %v1353_v25, 1 }
  0xe0   :  { %v412_v48 = vadd.f32 %v411_v6, %v386_v41  ;;  %v1411_v41 = vpop.permute.xlu0 %870 }
  0xe2   :  { %1176 = vset.pattern.permute.xlu1 %v1204_v0  ;;  %v431_v51 = vpop.permute.xlu1 %430 }
  0xe3   :  { %vm432_vm15 = vcmp.eq.s32.totalorder %v431_v51, 1  ;;  %967 = vperm.xlu1 %1176, %v1302_v37   ;;  %v1069_v37 = vld [vmem:[#allocation2 + $0xd] ss:$0 sm:$0xff] }
  0xe4   :  { %v437_v52 = vsel %vm432_vm15, %v1065_v50, %v428_v49  ;;  %v1090_v50 = vld [vmem:[#allocation2 + $0x61] ss:$0 sm:$0xff]  ;;  %v709_v13 = vpop.permute.xlu0 %708 }
  0xe5   :  { %v438_v1 = vadd.f32 %v437_v52, %v412_v48  ;;  %v1083_v48 = vld [vmem:[#allocation2 + $0xf] ss:$0 sm:$0xff]  ;;  %v595_v52 = vsel %vm586_vm10, %v1081_v38, %v1082_v8  ;;  %v1106_v8 = vld [vmem:[#allocation2 + $0x17] ss:$0 sm:$0xff] }
  0xe7   :  { %980 = vperm.xlu1 %1176, %v1314_v39   ;;  %v444_v56 = vpop.permute.xlu1 %443 }
  0xe8   :  { %vm445_vm1 = vcmp.eq.s32.totalorder %v444_v56, 1 }
  0xe9   :  { %v454_v57 = vsel %vm445_vm1, %v1066_v53, %v1067_v54  ;;  %v1086_v54 = vld [vmem:[#allocation2 + $0x2a] ss:$0 sm:$0xff] }
  0xea   :  { %v463_v58 = vsel %vm458_vm0, %v1068_v55, %v454_v57  ;;  %v1087_v57 = vld [vmem:[#allocation2 + $0x46] ss:$0 sm:$0xff] }
  0xeb   :  { %1178 = vset.pattern.permute.xlu1 %v1207_v15  ;;  %v464_v0 = vadd.f32 %v463_v58, %v438_v1  ;;  %v1091_v1 = vld [vmem:[#allocation2 + $0x62] ss:$0 sm:$0xff]  ;;  %v1088_v58 = vld [vmem:[#allocation2 + $0x47] ss:$0 sm:$0xff] }
  0xec   :  { %1006 = vperm.xlu1 %1178, %v1314_v39   ;;  %v475_v59 = vpop.permute.xlu1 %474 }
  0xed   :  { %vm476_vm2 = vcmp.eq.s32.totalorder %v475_v59, 1  ;;  %v1089_v59 = vld [vmem:[#allocation2 + $0x45] ss:$0 sm:$0xff] }
  0xee   :  { %v485_v62 = vsel %vm476_vm2, %v1069_v37, %v1070_v46  ;;  %v1093_v46 = vld [vmem:[#allocation2 + $0x13] ss:$0 sm:$0xff] }
  0xf0   :  { %v489_v61 = vpop.permute.xlu1 %488 }
  0xf1   :  { %vm490_vm3 = vcmp.eq.s32.totalorder %v489_v61, 1  ;;  %v674_v61 = vsel %vm665_vm14, %v1090_v50, %v1091_v1 }
  0xf2   :  { %v495_v63 = vsel %vm490_vm3, %v1071_v60, %v485_v62  ;;  %v1094_v60 = vld [vmem:[#allocation2 + $0x14] ss:$0 sm:$0xff]  ;;  %vm710_vm3 = vcmp.eq.s32.totalorder %v709_v13, 1 }
  0xf3   :  { %v496_v2 = vadd.f32 %v495_v63, %v464_v0 }
  0xf5   :  { %v515_v3 = vpop.permute.xlu1 %514 }
  0xf6   :  { %vm516_vm6 = vcmp.eq.s32.totalorder %v515_v3, 1 }
  0xf7   :  { %v521_v42 = vsel %vm516_vm6, %v1074_v31, %v512_v28 }
  0xf8   :  { %v522_v47 = vadd.f32 %v521_v42, %v496_v2  ;;  %v1424_v2 = vpop.permute.xlu0 %914  ;;  %v1104_v42 = vld [vmem:[#allocation2 + $0x63] ss:$0 sm:$0xff] }
  0xfa   :  { %v528_v4 = vpop.permute.xlu1 %527 }
  0xfb   :  { %vm529_vm5 = vcmp.eq.s32.totalorder %v528_v4, 1  ;;  %v1099_v4 = vld [vmem:[#allocation2 + $0x49] ss:$0 sm:$0xff] }
  0xfc   :  { %v538_v36 = vsel %vm529_vm5, %v1075_v29, %v1076_v30  ;;  %v1102_v29 = vld [vmem:[#allocation2 + $0x64] ss:$0 sm:$0xff]  ;;  %v1103_v30 = vld [vmem:[#allocation2 + $0x65] ss:$0 sm:$0xff] }
  0xfd   :  { %v547_v35 = vsel %vm542_vm7, %v1077_v40, %v538_v36  ;;  %v832_v40 = vpop.permute.xlu0 %831 }
  0xfe   :  { %v548_v53 = vadd.f32 %v547_v35, %v522_v47  ;;  %v1108_v35 = vld [vmem:[#allocation2 + $0x31] ss:$0 sm:$0xff]  ;;  %vm833_vm10 = vcmp.eq.s32.totalorder %v832_v40, 1  ;;  %v1111_v47 = vld [vmem:[#allocation2 + $0x4c] ss:$0 sm:$0xff] }
  0xff   :  { %v554_v5 = vpop.permute.xlu1 %553 }
 0x100   :  { %vm555_vm8 = vcmp.eq.s32.totalorder %v554_v5, 1 }
 0x101   :  { %v564_v6 = vsel %vm555_vm8, %v1078_v33, %v1079_v43  ;;  %v1105_v43 = vld [vmem:[#allocation2 + $0x16] ss:$0 sm:$0xff] }
 0x103   :  { %v567_v7 = vpop.permute.xlu1 %566 }
 0x104   :  { %vm568_vm9 = vcmp.eq.s32.totalorder %v567_v7, 1  ;;  %v1100_v7 = vld [vmem:[#allocation2 + $0x4a] ss:$0 sm:$0xff] }
 0x105   :  { %v573_v51 = vsel %vm568_vm9, %v1080_v20, %v564_v6  ;;  %v758_v28 = vsel %vm749_vm4, %v1099_v4, %v1100_v7  ;;  %v1112_v6 = vld [vmem:[#allocation2 + $0x4d] ss:$0 sm:$0xff]  ;;  %v1123_v7 = vld [vmem:[#allocation2 + $0x4f] ss:$0 sm:$0xff] }
 0x106   :  { %v574_v0 = vadd.f32 %v573_v51, %v548_v53 }
 0x108   :  { %v599_v9 = vpop.permute.xlu1 %598 }
 0x109   :  { %vm600_vm12 = vcmp.eq.s32.totalorder %v599_v9, 1 }
 0x10a   :  { %v605_v56 = vsel %vm600_vm12, %v1083_v48, %v595_v52  ;;  %v1110_v52 = vld [vmem:[#allocation2 + $0x30] ss:$0 sm:$0xff] }
 0x10b   :  { %v606_v62 = vadd.f32 %v605_v56, %v574_v0  ;;  %v1114_v56 = vld [vmem:[#allocation2 + $0x67] ss:$0 sm:$0xff]  ;;  %v955_v0 = vpop.permute.xlu0 %954 }
 0x10d   :  { %v612_v10 = vpop.permute.xlu1 %611 }
 0x10e   :  { %vm613_vm11 = vcmp.eq.s32.totalorder %v612_v10, 1  ;;  %v1095_v10 = vld [vmem:[#allocation2 + $0x12] ss:$0 sm:$0xff] }
 0x10f   :  { %v622_v55 = vsel %vm613_vm11, %v1084_v44, %v1085_v45  ;;  %v1109_v44 = vld [vmem:[#allocation2 + $0x32] ss:$0 sm:$0xff]  ;;  %vm788_vm11 = vcmp.eq.s32.totalorder %v1374_v34, 1  ;;  %v1107_v45 = vld [vmem:[#allocation2 + $0x15] ss:$0 sm:$0xff]  ;;  %v994_v4 = vpop.permute.xlu0 %993 }
 0x110   :  { %v631_v37 = vsel %vm626_vm13, %v1086_v54, %v622_v55  ;;  %v842_v51 = vsel %vm833_vm10, %v1108_v35, %v1109_v44  ;;  %v1113_v54 = vld [vmem:[#allocation2 + $0x4b] ss:$0 sm:$0xff]  ;;  %v1117_v55 = vld [vmem:[#allocation2 + $0x19] ss:$0 sm:$0xff] }
 0x111   :  { %v632_v5 = vadd.f32 %v631_v37, %v606_v62  ;;  %v1121_v37 = vld [vmem:[#allocation2 + $0x35] ss:$0 sm:$0xff] }
 0x112   :  { %v1386_v15 = vpop.permute.xlu1 %637 }
 0x113   :  { %vm639_vm15 = vcmp.eq.s32.totalorder %v1386_v15, 1 }
 0x114   :  { %v648_v63 = vsel %vm639_vm15, %v1087_v57, %v1088_v58  ;;  %v1116_v58 = vld [vmem:[#allocation2 + $0x66] ss:$0 sm:$0xff] }
 0x116   :  { %v1388_v11 = vpop.permute.xlu1 %650 }
 0x117   :  { %vm652_vm0 = vcmp.eq.s32.totalorder %v1388_v11, 1  ;;  %v1096_v11 = vld [vmem:[#allocation2 + $0x2e] ss:$0 sm:$0xff] }
 0x118   :  { %v657_v3 = vsel %vm652_vm0, %v1089_v59, %v648_v63  ;;  %vm872_vm0 = vcmp.eq.s32.totalorder %v1411_v41, 1  ;;  %v1120_v59 = vld [vmem:[#allocation2 + $0x34] ss:$0 sm:$0xff] }
 0x119   :  { %v658_v24 = vadd.f32 %v657_v3, %v632_v5  ;;  %v1122_v3 = vld [vmem:[#allocation2 + $0x33] ss:$0 sm:$0xff] }
 0x11b   :  { %v1390_v39 = vpop.permute.xlu1 %676 }
 0x11c   :  { %vm678_vm2 = vcmp.eq.s32.totalorder %v1390_v39, 1  ;;  %v1098_v39 = vld [vmem:[#allocation2 + $0x2d] ss:$0 sm:$0xff] }
 0x11d   :  { %v683_v15 = vsel %vm678_vm2, %v1092_v26, %v674_v61  ;;  %vm916_vm2 = vcmp.eq.s32.totalorder %v1424_v2, 1  ;;  %v1119_v61 = vld [vmem:[#allocation2 + $0x18] ss:$0 sm:$0xff] }
 0x11e   :  { %v684_v31 = vadd.f32 %v683_v15, %v658_v24 }
 0x120   :  { %v1392_v12 = vpop.permute.xlu1 %694 }
 0x121   :  { %vm696_vm1 = vcmp.eq.s32.totalorder %v1392_v12, 1  ;;  %v1097_v12 = vld [vmem:[#allocation2 + $0x2f] ss:$0 sm:$0xff] }
 0x122   :  { %v705_v9 = vsel %vm696_vm1, %v1093_v46, %v1094_v60 }
 0x123   :  { %v715_v27 = vsel %vm710_vm3, %v1095_v10, %v705_v9  ;;  %v1124_v9 = vld [vmem:[#allocation2 + $0x50] ss:$0 sm:$0xff]  ;;  %v1125_v10 = vld [vmem:[#allocation2 + $0x4e] ss:$0 sm:$0xff] }
 0x125   :  { %v1394_v14 = vpop.permute.xlu1 %721 }
 0x126   :  { %vm723_vm5 = vcmp.eq.s32.totalorder %v1394_v14, 1  ;;  %v716_v14 = vadd.f32 %v715_v27, %v684_v31 }
 0x127   :  { %v732_v36 = vsel %vm723_vm5, %v1096_v11, %v1097_v12  ;;  %vm956_vm5 = vcmp.eq.s32.totalorder %v955_v0, 1  ;;  %v1126_v12 = vld [vmem:[#allocation2 + $0x6a] ss:$0 sm:$0xff] }
 0x129   :  { %v1396_v16 = vpop.permute.xlu1 %734 }
 0x12a   :  { %vm736_vm6 = vcmp.eq.s32.totalorder %v1396_v16, 1 }
 0x12b   :  { %v741_v38 = vsel %vm736_vm6, %v1098_v39, %v732_v36 }
 0x12e   :  { %v1398_v17 = vpop.permute.xlu1 %760 }
 0x12f   :  { %vm762_vm8 = vcmp.eq.s32.totalorder %v1398_v17, 1 }
 0x130   :  { %v767_v16 = vsel %vm762_vm8, %v1101_v22, %v758_v28  ;;  %vm995_vm8 = vcmp.eq.s32.totalorder %v994_v4, 1  ;;  %v1128_v28 = vld [vmem:[#allocation2 + $0x69] ss:$0 sm:$0xff] }
 0x133   :  { %v1400_v18 = vpop.permute.xlu1 %773 }
 0x134   :  { %vm775_vm7 = vcmp.eq.s32.totalorder %v1400_v18, 1  ;;  %v742_v18 = vadd.f32 %v741_v38, %v716_v14 }
 0x135   :  { %v784_v33 = vsel %vm775_vm7, %v1102_v29, %v1103_v30 }
 0x136   :  { %v793_v17 = vsel %vm788_vm11, %v1104_v42, %v784_v33  ;;  %v768_v48 = vadd.f32 %v767_v16, %v742_v18 }
 0x138   :  { %v1402_v21 = vpop.permute.xlu1 %804  ;;  %v794_v53 = vadd.f32 %v793_v17, %v768_v48 }
 0x139   :  { %vm806_vm9 = vcmp.eq.s32.totalorder %v1402_v21, 1 }
 0x13a   :  { %v815_v50 = vsel %vm806_vm9, %v1105_v43, %v1106_v8 }
 0x13c   :  { %v1406_v23 = vpop.permute.xlu1 %818 }
 0x13d   :  { %vm820_vm12 = vcmp.eq.s32.totalorder %v1406_v23, 1  ;;  %v1115_v23 = vld [vmem:[#allocation2 + $0x68] ss:$0 sm:$0xff] }
 0x13e   :  { %v825_v21 = vsel %vm820_vm12, %v1107_v45, %v815_v50 }
 0x13f   :  { %v826_v57 = vadd.f32 %v825_v21, %v794_v53 }
 0x141   :  { %v1409_v32 = vpop.permute.xlu1 %844 }
 0x142   :  { %vm846_vm14 = vcmp.eq.s32.totalorder %v1409_v32, 1 }
 0x143   :  { %v851_v13 = vsel %vm846_vm14, %v1110_v52, %v842_v51 }
 0x144   :  { %v852_v46 = vadd.f32 %v851_v13, %v826_v57 }
 0x146   :  { %v1414_v49 = vpop.permute.xlu1 %857 }
 0x147   :  { %vm859_vm13 = vcmp.eq.s32.totalorder %v1414_v49, 1  ;;  %v1118_v49 = vld [vmem:[#allocation2 + $0x1a] ss:$0 sm:$0xff] }
 0x148   :  { %v868_v34 = vsel %vm859_vm13, %v1111_v47, %v1112_v6  ;;  %v925_v63 = vsel %vm916_vm2, %v1117_v55, %v1118_v49 }
 0x149   :  { %v877_v32 = vsel %vm872_vm0, %v1113_v54, %v868_v34 }
 0x14a   :  { %v878_v41 = vadd.f32 %v877_v32, %v852_v46 }
 0x14b   :  { %v1421_v25 = vpop.permute.xlu1 %883 }
 0x14c   :  { %vm885_vm15 = vcmp.eq.s32.totalorder %v1421_v25, 1 }
 0x14d   :  { %v894_v60 = vsel %vm885_vm15, %v1114_v56, %v1115_v23 }
 0x14f   :  { %v1428_v19 = vpop.permute.xlu1 %896 }
 0x150   :  { %vm898_vm1 = vcmp.eq.s32.totalorder %v1428_v19, 1  ;;  %v1127_v19 = vld [vmem:[#allocation2 + $0x6b] ss:$0 sm:$0xff] }
 0x151   :  { %v903_v25 = vsel %vm898_vm1, %v1116_v58, %v894_v60  ;;  %v1004_v30 = vsel %vm995_vm8, %v1126_v12, %v1127_v19 }
 0x152   :  { %v904_v2 = vadd.f32 %v903_v25, %v878_v41 }
 0x154   :  { %v929_v20 = vpop.permute.xlu1 %928 }
 0x155   :  { %vm930_vm4 = vcmp.eq.s32.totalorder %v929_v20, 1 }
 0x156   :  { %v935_v5 = vsel %vm930_vm4, %v1119_v61, %v925_v63 }
 0x157   :  { %v936_v24 = vadd.f32 %v935_v5, %v904_v2 }
 0x159   :  { %v942_v1 = vpop.permute.xlu1 %941 }
 0x15a   :  { %vm943_vm3 = vcmp.eq.s32.totalorder %v942_v1, 1 }
 0x15b   :  { %v952_v26 = vsel %vm943_vm3, %v1120_v59, %v1121_v37 }
 0x15c   :  { %v961_v11 = vsel %vm956_vm5, %v1122_v3, %v952_v26 }
 0x15d   :  { %v962_v29 = vadd.f32 %v961_v11, %v936_v24 }
 0x15e   :  { %v968_v62 = vpop.permute.xlu1 %967 }
 0x15f   :  { %vm969_vm6 = vcmp.eq.s32.totalorder %v968_v62, 1 }
 0x160   :  { %v978_v39 = vsel %vm969_vm6, %v1123_v7, %v1124_v9 }
 0x162   :  { %v981_v15 = vpop.permute.xlu1 %980 }
 0x163   :  { %vm982_vm7 = vcmp.eq.s32.totalorder %v981_v15, 1 }
 0x164   :  { %v987_v27 = vsel %vm982_vm7, %v1125_v10, %v978_v39 }
 0x165   :  { %v988_v36 = vadd.f32 %v987_v27, %v962_v29 }
 0x167   :  { %v1007_v31 = vpop.permute.xlu1 %1006 }
 0x168   :  { %vm1008_vm9 = vcmp.eq.s32.totalorder %v1007_v31, 1 }
 0x169   :  { %v1013_v22 = vsel %vm1008_vm9, %v1128_v28, %v1004_v30 }
 0x16a   :  { %v1014_v40 = vadd.f32 %v1013_v22, %v988_v36 }
 0x16c   :  { %1015 = vst [vmem:[%s1447_s2] sm:$0xf] %v1014_v40 }
 0x16d   :  { %1020 = vsyncpa [#allocation3], 1 }

</bundles_post_ra>
